<compile_context>
chip_gen: v7x
topology: tpu7x:2x2x1
jax: 0.10.0
libtpu: 0.0.40
codegen_flags: <defaults>
</compile_context>

<pallas_src>
import functools

import jax
import jax.numpy as jnp
import numpy as np
from jax import lax
from jax.experimental import pallas as pl
from jax.experimental.pallas import tpu as pltpu

LN_EPS = 1e-5      # nn.LayerNorm default
NEG_FILL = -1e30   # finite masked fill (avoids NaN for fully-masked rows)


def _layer_norm(x, gamma, beta):
    """One-pass LayerNorm over the last axis: var = E[x^2] - E[x]^2."""
    mean = jnp.mean(x, axis=-1, keepdims=True)
    mean_sq = jnp.mean(x * x, axis=-1, keepdims=True)
    var = mean_sq - mean * mean
    return (x - mean) * lax.rsqrt(var + LN_EPS) * gamma + beta


def _mha_block(x, kv, attn_bias, wq, bq, wk, bk, wv, bv, wo, bo, gamma, beta,
               *, n_head, d_k, d_v, inv_temp):
    """Multi-head attention + residual + LayerNorm on one (Lq, D) tile.

    Heads are processed with head-batched contractions (no per-head matmul
    against wo). Returns (normed_out (Lq, D), attn (H, Lq, Lk))."""
    # Full-width projections: one MXU matmul each, all heads at once.
    q = jnp.dot(x, wq, preferred_element_type=jnp.float32) + bq     # (Lq, H*dk)
    k = jnp.dot(kv, wk, preferred_element_type=jnp.float32) + bk    # (Lk, H*dk)
    v = jnp.dot(kv, wv, preferred_element_type=jnp.float32) + bv    # (Lk, H*dv)

    # Head-major stacking (layout only) -> (H, L, d).
    qh = jnp.stack([q[:, h * d_k:(h + 1) * d_k] for h in range(n_head)], axis=0)
    kh = jnp.stack([k[:, h * d_k:(h + 1) * d_k] for h in range(n_head)], axis=0)
    vh = jnp.stack([v[:, h * d_v:(h + 1) * d_v] for h in range(n_head)], axis=0)

    # Batched-over-heads scores / softmax / context.
    scores = jnp.einsum('hqd,hkd->hqk', qh, kh,
                        preferred_element_type=jnp.float32) * inv_temp
    scores = scores + attn_bias[None, :, :]          # additive mask (hoisted compare)
    scores = scores - jnp.max(scores, axis=-1, keepdims=True)
    e = jnp.exp(scores)
    denom = jnp.sum(e, axis=-1, keepdims=True)
    attn = e * pl.reciprocal(denom, approx=True)     # (H, Lq, Lk)

    ctx = jnp.einsum('hqk,hkd->hqd', attn, vh,
                     preferred_element_type=jnp.float32)              # (H, Lq, dv)
    ctx_cat = jnp.concatenate([ctx[h] for h in range(n_head)], axis=-1)  # (Lq, H*dv)

    # Single output projection over the concatenated heads + residual.
    out = jnp.dot(ctx_cat, wo, preferred_element_type=jnp.float32) + bo + x
    # TODO(synk): dropout after the fc is identity (eval mode).
    return _layer_norm(out, gamma, beta), attn


def decoder_layer_kernel(
        dec_ref, enc_ref, slf_mask_ref, enc_mask_ref,
        s_wq, s_bq, s_wk, s_bk, s_wv, s_bv, s_wo, s_bo, s_g, s_b,
        c_wq, c_bq, c_wk, c_bk, c_wv, c_bv, c_wo, c_bo, c_g, c_b,
        f_w1, f_b1, f_w2, f_b2, f_g, f_b,
        out_ref, slf_attn_ref, enc_attn_ref,
        *, n_head, d_k, d_v, inv_temp):
    lq = dec_ref.shape[1]
    lk_enc = enc_ref.shape[1]

    x = dec_ref[0].astype(jnp.float32)        # (Lq, D)
    kv_enc = enc_ref[0].astype(jnp.float32)   # (Lk, D)

    # Mask compare once per tile; finite fill instead of -inf.
    slf_bias = jnp.where(slf_mask_ref[0] > 0, NEG_FILL, 0.0).astype(jnp.float32)
    enc_bias = jnp.where(enc_mask_ref[0] > 0, NEG_FILL, 0.0).astype(jnp.float32)

    # --- stage 1: masked self-attention + add & norm ---
    x, slf_attn = _mha_block(
        x, x, slf_bias,
        s_wq[...], s_bq[...], s_wk[...], s_bk[...], s_wv[...], s_bv[...],
        s_wo[...], s_bo[...], s_g[...], s_b[...],
        n_head=n_head, d_k=d_k, d_v=d_v, inv_temp=inv_temp)
    slf_attn_ref[...] = slf_attn.reshape(n_head, 1, lq, lq).astype(slf_attn_ref.dtype)

    # --- stage 2: encoder-decoder attention + add & norm ---
    x, enc_attn = _mha_block(
        x, kv_enc, enc_bias,
        c_wq[...], c_bq[...], c_wk[...], c_bk[...], c_wv[...], c_bv[...],
        c_wo[...], c_bo[...], c_g[...], c_b[...],
        n_head=n_head, d_k=d_k, d_v=d_v, inv_temp=inv_temp)
    enc_attn_ref[...] = enc_attn.reshape(n_head, 1, lq, lk_enc).astype(enc_attn_ref.dtype)

    # --- stage 3: position-wise FFN (Conv1d k=1 == per-position matmul) ---
    h = jnp.dot(x, f_w1[...], preferred_element_type=jnp.float32) + f_b1[...]
    h = jnp.maximum(h, 0.0)                                           # ReLU
    y = jnp.dot(h, f_w2[...], preferred_element_type=jnp.float32) + f_b2[...] + x
    # TODO(synk): FFN dropout is identity (eval mode).
    out_ref[0] = _layer_norm(y, f_g[...], f_b[...]).astype(out_ref.dtype)


def decoder_layer(enc_output, dec_input, slf_attn_mask, dec_enc_attn_mask,
                  slf_params, enc_params, ffn_params, n_head, d_k, d_v,
                  attn_dtype=jnp.float32):
    """Fused decoder layer. Returns (dec_out, slf_attn, enc_attn) with the
    PyTorch attention layout (n_head * B, Lq, Lk), head-major."""
    B, Lq, D = dec_input.shape
    Lk = enc_output.shape[1]
    inv_temp = 1.0 / float(np.power(d_k, 0.5))

    kernel = functools.partial(decoder_layer_kernel, n_head=n_head, d_k=d_k,
                               d_v=d_v, inv_temp=inv_temp)

    def full_spec(shape):
        return pl.BlockSpec(shape, lambda b: (0,) * len(shape))

    params = (*slf_params, *enc_params, *ffn_params)
    in_specs = [
        pl.BlockSpec((1, Lq, D), lambda b: (b, 0, 0)),    # dec_input
        pl.BlockSpec((1, Lk, D), lambda b: (b, 0, 0)),    # enc_output
        pl.BlockSpec((1, Lq, Lq), lambda b: (b, 0, 0)),   # self-attn mask
        pl.BlockSpec((1, Lq, Lk), lambda b: (b, 0, 0)),   # enc-dec attn mask
    ] + [full_spec(p.shape) for p in params]

    out, slf_attn, enc_attn = pl.pallas_call(
        kernel,
        out_shape=(
            jax.ShapeDtypeStruct((B, Lq, D), dec_input.dtype),
            # head-major: the final (H*B, Lq, Lk) layout is a free reshape
            jax.ShapeDtypeStruct((n_head, B, Lq, Lq), attn_dtype),
            jax.ShapeDtypeStruct((n_head, B, Lq, Lk), attn_dtype),
        ),
        grid=(B,),
        in_specs=in_specs,
        out_specs=(
            pl.BlockSpec((1, Lq, D), lambda b: (b, 0, 0)),
            pl.BlockSpec((n_head, 1, Lq, Lq), lambda b: (0, b, 0, 0)),
            pl.BlockSpec((n_head, 1, Lq, Lk), lambda b: (0, b, 0, 0)),
        ),
        compiler_params=pltpu.CompilerParams(dimension_semantics=("parallel",)),
    )(dec_input, enc_output, slf_attn_mask, dec_enc_attn_mask, *params)

    slf_attn = slf_attn.reshape(n_head * B, Lq, Lq)   # contiguous, no transpose
    enc_attn = enc_attn.reshape(n_head * B, Lq, Lk)
    return out, slf_attn, enc_attn


# ----------------------------------------------------------------------------
# Deterministic parameter construction + example run.
# ----------------------------------------------------------------------------
def make_mha_params(key, d_model, n_head, d_k, d_v):
    ks = jax.random.split(key, 8)
    s = 0.1
    wq = jax.random.normal(ks[0], (d_model, n_head * d_k), jnp.float32) * s
    bq = jax.random.normal(ks[1], (1, n_head * d_k), jnp.float32) * s
    wk = jax.random.normal(ks[2], (d_model, n_head * d_k), jnp.float32) * s
    bk = jax.random.normal(ks[3], (1, n_head * d_k), jnp.float32) * s
    wv = jax.random.normal(ks[4], (d_model, n_head * d_v), jnp.float32) * s
    bv = jax.random.normal(ks[5], (1, n_head * d_v), jnp.float32) * s
    wo = jax.random.normal(ks[6], (n_head * d_v, d_model), jnp.float32) * s
    bo = jax.random.normal(ks[7], (1, d_model), jnp.float32) * s
    gamma = jnp.ones((1, d_model), jnp.float32)
    beta = jnp.zeros((1, d_model), jnp.float32)
    return (wq, bq, wk, bk, wv, bv, wo, bo, gamma, beta)


def make_ffn_params(key, d_model, d_inner):
    ks = jax.random.split(key, 4)
    s = 0.1
    w1 = jax.random.normal(ks[0], (d_model, d_inner), jnp.float32) * s
    b1 = jax.random.normal(ks[1], (1, d_inner), jnp.float32) * s
    w2 = jax.random.normal(ks[2], (d_inner, d_model), jnp.float32) * s
    b2 = jax.random.normal(ks[3], (1, d_model), jnp.float32) * s
    gamma = jnp.ones((1, d_model), jnp.float32)
    beta = jnp.zeros((1, d_model), jnp.float32)
    return (w1, b1, w2, b2, gamma, beta)


if __name__ == "__main__":
    B, L_DEC, L_ENC = 2, 8, 8
    MODEL_D, INNER_D, N_HEAD, D_K, D_V = 32, 64, 2, 16, 16

    root = jax.random.PRNGKey(0)
    k_enc, k_dec, k_slf, k_xattn, k_ffn = jax.random.split(root, 5)

    enc_output = jax.random.normal(k_enc, (B, L_ENC, MODEL_D), jnp.float32)
    dec_input = jax.random.normal(k_dec, (B, L_DEC, MODEL_D), jnp.float32)

    # Self-attention mask: causal (mask future positions); >0 means masked.
    slf_attn_mask = jnp.broadcast_to(
        jnp.triu(jnp.ones((L_DEC, L_DEC), jnp.float32), k=1), (B, L_DEC, L_DEC))
    # Encoder-decoder attention: no masking.
    dec_enc_attn_mask = jnp.zeros((B, L_DEC, L_ENC), jnp.float32)

    slf_params = make_mha_params(k_slf, MODEL_D, N_HEAD, D_K, D_V)
    enc_params = make_mha_params(k_xattn, MODEL_D, N_HEAD, D_K, D_V)
    ffn_params = make_ffn_params(k_ffn, MODEL_D, INNER_D)

    dec_out, slf_attn, enc_attn = decoder_layer(
        enc_output, dec_input, slf_attn_mask, dec_enc_attn_mask,
        slf_params, enc_params, ffn_params, N_HEAD, D_K, D_V)

    jax.block_until_ready((dec_out, slf_attn, enc_attn))
    assert dec_out.shape == (B, L_DEC, MODEL_D)
    assert slf_attn.shape == (N_HEAD * B, L_DEC, L_DEC)
    assert enc_attn.shape == (N_HEAD * B, L_DEC, L_ENC)
    assert bool(jnp.all(jnp.isfinite(dec_out)))
    assert bool(jnp.all(jnp.isfinite(slf_attn)))
    assert bool(jnp.all(jnp.isfinite(enc_attn)))
    print("KERNEL_OK")
</pallas_src>

<mosaic_0001>
module attributes {stable_mosaic.version = 11 : i64} {
  func.func @decoder_layer_kernel(%arg0: i32, %arg1: memref<1x8x32xf32, #tpu.memory_space<vmem>>, %arg2: memref<1x8x32xf32, #tpu.memory_space<vmem>>, %arg3: memref<1x8x8xf32, #tpu.memory_space<vmem>>, %arg4: memref<1x8x8xf32, #tpu.memory_space<vmem>>, %arg5: memref<32x32xf32, #tpu.memory_space<vmem>>, %arg6: memref<1x32xf32, #tpu.memory_space<vmem>>, %arg7: memref<32x32xf32, #tpu.memory_space<vmem>>, %arg8: memref<1x32xf32, #tpu.memory_space<vmem>>, %arg9: memref<32x32xf32, #tpu.memory_space<vmem>>, %arg10: memref<1x32xf32, #tpu.memory_space<vmem>>, %arg11: memref<32x32xf32, #tpu.memory_space<vmem>>, %arg12: memref<1x32xf32, #tpu.memory_space<vmem>>, %arg13: memref<1x32xf32, #tpu.memory_space<vmem>>, %arg14: memref<1x32xf32, #tpu.memory_space<vmem>>, %arg15: memref<32x32xf32, #tpu.memory_space<vmem>>, %arg16: memref<1x32xf32, #tpu.memory_space<vmem>>, %arg17: memref<32x32xf32, #tpu.memory_space<vmem>>, %arg18: memref<1x32xf32, #tpu.memory_space<vmem>>, %arg19: memref<32x32xf32, #tpu.memory_space<vmem>>, %arg20: memref<1x32xf32, #tpu.memory_space<vmem>>, %arg21: memref<32x32xf32, #tpu.memory_space<vmem>>, %arg22: memref<1x32xf32, #tpu.memory_space<vmem>>, %arg23: memref<1x32xf32, #tpu.memory_space<vmem>>, %arg24: memref<1x32xf32, #tpu.memory_space<vmem>>, %arg25: memref<32x64xf32, #tpu.memory_space<vmem>>, %arg26: memref<1x64xf32, #tpu.memory_space<vmem>>, %arg27: memref<64x32xf32, #tpu.memory_space<vmem>>, %arg28: memref<1x32xf32, #tpu.memory_space<vmem>>, %arg29: memref<1x32xf32, #tpu.memory_space<vmem>>, %arg30: memref<1x32xf32, #tpu.memory_space<vmem>>, %arg31: memref<1x8x32xf32, #tpu.memory_space<vmem>>, %arg32: memref<2x1x8x8xf32, #tpu.memory_space<vmem>>, %arg33: memref<2x1x8x8xf32, #tpu.memory_space<vmem>>) attributes {dimension_semantics = [#tpu.dimension_semantics<parallel>], iteration_bounds = array<i64: 2>, scalar_prefetch = 0 : i64, scratch_operands = 0 : i64, tpu.core_type = #tpu.core_type<tc>, window_params = [{transform_indices = @transform_0, window_bounds = array<i64: 1, 8, 32>}, {transform_indices = @transform_1, window_bounds = array<i64: 1, 8, 32>}, {transform_indices = @transform_2, window_bounds = array<i64: 1, 8, 8>}, {transform_indices = @transform_3, window_bounds = array<i64: 1, 8, 8>}, {pipeline_mode = #tpu.pipeline_mode<synchronous>, transform_indices = @transform_4, window_bounds = array<i64: 32, 32>}, {pipeline_mode = #tpu.pipeline_mode<synchronous>, transform_indices = @transform_5, window_bounds = array<i64: 1, 32>}, {pipeline_mode = #tpu.pipeline_mode<synchronous>, transform_indices = @transform_6, window_bounds = array<i64: 32, 32>}, {pipeline_mode = #tpu.pipeline_mode<synchronous>, transform_indices = @transform_7, window_bounds = array<i64: 1, 32>}, {pipeline_mode = #tpu.pipeline_mode<synchronous>, transform_indices = @transform_8, window_bounds = array<i64: 32, 32>}, {pipeline_mode = #tpu.pipeline_mode<synchronous>, transform_indices = @transform_9, window_bounds = array<i64: 1, 32>}, {pipeline_mode = #tpu.pipeline_mode<synchronous>, transform_indices = @transform_10, window_bounds = array<i64: 32, 32>}, {pipeline_mode = #tpu.pipeline_mode<synchronous>, transform_indices = @transform_11, window_bounds = array<i64: 1, 32>}, {pipeline_mode = #tpu.pipeline_mode<synchronous>, transform_indices = @transform_12, window_bounds = array<i64: 1, 32>}, {pipeline_mode = #tpu.pipeline_mode<synchronous>, transform_indices = @transform_13, window_bounds = array<i64: 1, 32>}, {pipeline_mode = #tpu.pipeline_mode<synchronous>, transform_indices = @transform_14, window_bounds = array<i64: 32, 32>}, {pipeline_mode = #tpu.pipeline_mode<synchronous>, transform_indices = @transform_15, window_bounds = array<i64: 1, 32>}, {pipeline_mode = #tpu.pipeline_mode<synchronous>, transform_indices = @transform_16, window_bounds = array<i64: 32, 32>}, {pipeline_mode = #tpu.pipeline_mode<synchronous>, transform_indices = @transform_17, window_bounds = array<i64: 1, 32>}, {pipeline_mode = #tpu.pipeline_mode<synchronous>, transform_indices = @transform_18, window_bounds = array<i64: 32, 32>}, {pipeline_mode = #tpu.pipeline_mode<synchronous>, transform_indices = @transform_19, window_bounds = array<i64: 1, 32>}, {pipeline_mode = #tpu.pipeline_mode<synchronous>, transform_indices = @transform_20, window_bounds = array<i64: 32, 32>}, {pipeline_mode = #tpu.pipeline_mode<synchronous>, transform_indices = @transform_21, window_bounds = array<i64: 1, 32>}, {pipeline_mode = #tpu.pipeline_mode<synchronous>, transform_indices = @transform_22, window_bounds = array<i64: 1, 32>}, {pipeline_mode = #tpu.pipeline_mode<synchronous>, transform_indices = @transform_23, window_bounds = array<i64: 1, 32>}, {pipeline_mode = #tpu.pipeline_mode<synchronous>, transform_indices = @transform_24, window_bounds = array<i64: 32, 64>}, {pipeline_mode = #tpu.pipeline_mode<synchronous>, transform_indices = @transform_25, window_bounds = array<i64: 1, 64>}, {pipeline_mode = #tpu.pipeline_mode<synchronous>, transform_indices = @transform_26, window_bounds = array<i64: 64, 32>}, {pipeline_mode = #tpu.pipeline_mode<synchronous>, transform_indices = @transform_27, window_bounds = array<i64: 1, 32>}, {pipeline_mode = #tpu.pipeline_mode<synchronous>, transform_indices = @transform_28, window_bounds = array<i64: 1, 32>}, {pipeline_mode = #tpu.pipeline_mode<synchronous>, transform_indices = @transform_29, window_bounds = array<i64: 1, 32>}, {transform_indices = @transform_30, window_bounds = array<i64: 1, 8, 32>}, {transform_indices = @transform_31, window_bounds = array<i64: 2, 1, 8, 8>}, {transform_indices = @transform_32, window_bounds = array<i64: 2, 1, 8, 8>}]} {
    %c0 = arith.constant 0 : index
    %c0_0 = arith.constant 0 : index
    %c0_1 = arith.constant 0 : index
    %0 = vector.load %arg1[%c0, %c0_0, %c0_1] : memref<1x8x32xf32, #tpu.memory_space<vmem>>, vector<1x8x32xf32>
    %1 = vector.shape_cast %0 : vector<1x8x32xf32> to vector<8x32xf32>
    %c0_2 = arith.constant 0 : index
    %c0_3 = arith.constant 0 : index
    %c0_4 = arith.constant 0 : index
    %2 = vector.load %arg2[%c0_2, %c0_3, %c0_4] : memref<1x8x32xf32, #tpu.memory_space<vmem>>, vector<1x8x32xf32>
    %3 = vector.shape_cast %2 : vector<1x8x32xf32> to vector<8x32xf32>
    %c0_5 = arith.constant 0 : index
    %c0_6 = arith.constant 0 : index
    %c0_7 = arith.constant 0 : index
    %4 = vector.load %arg3[%c0_5, %c0_6, %c0_7] : memref<1x8x8xf32, #tpu.memory_space<vmem>>, vector<1x8x8xf32>
    %5 = vector.shape_cast %4 : vector<1x8x8xf32> to vector<8x8xf32>
    %cst = arith.constant 0.000000e+00 : f32
    %6 = vector.broadcast %cst : f32 to vector<8x8xf32>
    %7 = arith.cmpf ogt, %5, %6 : vector<8x8xf32>
    %cst_8 = arith.constant -1.000000e+30 : f32
    %cst_9 = arith.constant 0.000000e+00 : f32
    %8 = vector.broadcast %cst_8 : f32 to vector<8x8xf32>
    %9 = vector.broadcast %cst_9 : f32 to vector<8x8xf32>
    %10 = arith.select %7, %8, %9 : vector<8x8xi1>, vector<8x8xf32>
    %c0_10 = arith.constant 0 : index
    %c0_11 = arith.constant 0 : index
    %c0_12 = arith.constant 0 : index
    %11 = vector.load %arg4[%c0_10, %c0_11, %c0_12] : memref<1x8x8xf32, #tpu.memory_space<vmem>>, vector<1x8x8xf32>
    %12 = vector.shape_cast %11 : vector<1x8x8xf32> to vector<8x8xf32>
    %cst_13 = arith.constant 0.000000e+00 : f32
    %13 = vector.broadcast %cst_13 : f32 to vector<8x8xf32>
    %14 = arith.cmpf ogt, %12, %13 : vector<8x8xf32>
    %cst_14 = arith.constant -1.000000e+30 : f32
    %cst_15 = arith.constant 0.000000e+00 : f32
    %15 = vector.broadcast %cst_14 : f32 to vector<8x8xf32>
    %16 = vector.broadcast %cst_15 : f32 to vector<8x8xf32>
    %17 = arith.select %14, %15, %16 : vector<8x8xi1>, vector<8x8xf32>
    %c0_16 = arith.constant 0 : index
    %c0_17 = arith.constant 0 : index
    %18 = vector.load %arg5[%c0_16, %c0_17] : memref<32x32xf32, #tpu.memory_space<vmem>>, vector<32x32xf32>
    %c0_18 = arith.constant 0 : index
    %c0_19 = arith.constant 0 : index
    %19 = vector.load %arg6[%c0_18, %c0_19] : memref<1x32xf32, #tpu.memory_space<vmem>>, vector<1x32xf32>
    %c0_20 = arith.constant 0 : index
    %c0_21 = arith.constant 0 : index
    %20 = vector.load %arg7[%c0_20, %c0_21] : memref<32x32xf32, #tpu.memory_space<vmem>>, vector<32x32xf32>
    %c0_22 = arith.constant 0 : index
    %c0_23 = arith.constant 0 : index
    %21 = vector.load %arg8[%c0_22, %c0_23] : memref<1x32xf32, #tpu.memory_space<vmem>>, vector<1x32xf32>
    %c0_24 = arith.constant 0 : index
    %c0_25 = arith.constant 0 : index
    %22 = vector.load %arg9[%c0_24, %c0_25] : memref<32x32xf32, #tpu.memory_space<vmem>>, vector<32x32xf32>
    %c0_26 = arith.constant 0 : index
    %c0_27 = arith.constant 0 : index
    %23 = vector.load %arg10[%c0_26, %c0_27] : memref<1x32xf32, #tpu.memory_space<vmem>>, vector<1x32xf32>
    %c0_28 = arith.constant 0 : index
    %c0_29 = arith.constant 0 : index
    %24 = vector.load %arg11[%c0_28, %c0_29] : memref<32x32xf32, #tpu.memory_space<vmem>>, vector<32x32xf32>
    %c0_30 = arith.constant 0 : index
    %c0_31 = arith.constant 0 : index
    %25 = vector.load %arg12[%c0_30, %c0_31] : memref<1x32xf32, #tpu.memory_space<vmem>>, vector<1x32xf32>
    %c0_32 = arith.constant 0 : index
    %c0_33 = arith.constant 0 : index
    %26 = vector.load %arg13[%c0_32, %c0_33] : memref<1x32xf32, #tpu.memory_space<vmem>>, vector<1x32xf32>
    %c0_34 = arith.constant 0 : index
    %c0_35 = arith.constant 0 : index
    %27 = vector.load %arg14[%c0_34, %c0_35] : memref<1x32xf32, #tpu.memory_space<vmem>>, vector<1x32xf32>
    %cst_36 = arith.constant dense<0.000000e+00> : vector<8x32xf32>
    %28 = tpu.matmul %1, %18, %cst_36 {dimension_numbers = #tpu.dot_dimension_numbers<[1], [0], [0], [1], [0, 0, 1, 1], [], []>} : vector<8x32xf32>, vector<32x32xf32>, vector<8x32xf32> -> vector<8x32xf32>
    %29 = vector.broadcast %19 : vector<1x32xf32> to vector<8x32xf32>
    %30 = arith.addf %28, %29 : vector<8x32xf32>
    %cst_37 = arith.constant dense<0.000000e+00> : vector<8x32xf32>
    %31 = tpu.matmul %1, %20, %cst_37 {dimension_numbers = #tpu.dot_dimension_numbers<[1], [0], [0], [1], [0, 0, 1, 1], [], []>} : vector<8x32xf32>, vector<32x32xf32>, vector<8x32xf32> -> vector<8x32xf32>
    %32 = vector.broadcast %21 : vector<1x32xf32> to vector<8x32xf32>
    %33 = arith.addf %31, %32 : vector<8x32xf32>
    %cst_38 = arith.constant dense<0.000000e+00> : vector<8x32xf32>
    %34 = tpu.matmul %1, %22, %cst_38 {dimension_numbers = #tpu.dot_dimension_numbers<[1], [0], [0], [1], [0, 0, 1, 1], [], []>} : vector<8x32xf32>, vector<32x32xf32>, vector<8x32xf32> -> vector<8x32xf32>
    %35 = vector.broadcast %23 : vector<1x32xf32> to vector<8x32xf32>
    %36 = arith.addf %34, %35 : vector<8x32xf32>
    %37 = vector.extract_strided_slice %30 {offsets = [0, 0], sizes = [8, 16], strides = [1, 1]} : vector<8x32xf32> to vector<8x16xf32>
    %38 = vector.extract_strided_slice %30 {offsets = [0, 16], sizes = [8, 16], strides = [1, 1]} : vector<8x32xf32> to vector<8x16xf32>
    %39 = vector.shape_cast %37 : vector<8x16xf32> to vector<1x8x16xf32>
    %40 = vector.shape_cast %38 : vector<8x16xf32> to vector<1x8x16xf32>
    %41 = tpu.concatenate %39, %40 in 0 : vector<1x8x16xf32>, vector<1x8x16xf32> -> vector<2x8x16xf32>
    %42 = vector.extract_strided_slice %33 {offsets = [0, 0], sizes = [8, 16], strides = [1, 1]} : vector<8x32xf32> to vector<8x16xf32>
    %43 = vector.extract_strided_slice %33 {offsets = [0, 16], sizes = [8, 16], strides = [1, 1]} : vector<8x32xf32> to vector<8x16xf32>
    %44 = vector.shape_cast %42 : vector<8x16xf32> to vector<1x8x16xf32>
    %45 = vector.shape_cast %43 : vector<8x16xf32> to vector<1x8x16xf32>
    %46 = tpu.concatenate %44, %45 in 0 : vector<1x8x16xf32>, vector<1x8x16xf32> -> vector<2x8x16xf32>
    %47 = vector.extract_strided_slice %36 {offsets = [0, 0], sizes = [8, 16], strides = [1, 1]} : vector<8x32xf32> to vector<8x16xf32>
    %48 = vector.extract_strided_slice %36 {offsets = [0, 16], sizes = [8, 16], strides = [1, 1]} : vector<8x32xf32> to vector<8x16xf32>
    %49 = vector.shape_cast %47 : vector<8x16xf32> to vector<1x8x16xf32>
    %50 = vector.shape_cast %48 : vector<8x16xf32> to vector<1x8x16xf32>
    %51 = tpu.concatenate %49, %50 in 0 : vector<1x8x16xf32>, vector<1x8x16xf32> -> vector<2x8x16xf32>
    "tpu.trace_start"() <{level = 10 : i32, message = "hqd,hkd->hqk"}> : () -> ()
    %cst_39 = arith.constant dense<0.000000e+00> : vector<2x8x8xf32>
    %52 = tpu.matmul %41, %46, %cst_39 {dimension_numbers = #tpu.dot_dimension_numbers<[2], [2], [1], [1], [0, 0, 0, 1, 1, 1], [0], [0]>} : vector<2x8x16xf32>, vector<2x8x16xf32>, vector<2x8x8xf32> -> vector<2x8x8xf32>
    "tpu.trace_stop"() : () -> ()
    %cst_40 = arith.constant 2.500000e-01 : f32
    %53 = vector.broadcast %cst_40 : f32 to vector<2x8x8xf32>
    %54 = arith.mulf %52, %53 : vector<2x8x8xf32>
    %55 = vector.shape_cast %10 : vector<8x8xf32> to vector<1x8x8xf32>
    %56 = vector.broadcast %55 : vector<1x8x8xf32> to vector<2x8x8xf32>
    %57 = arith.addf %54, %56 : vector<2x8x8xf32>
    %cst_41 = arith.constant dense<0xFF800000> : vector<2x8xf32>
    %58 = vector.multi_reduction <maximumf>, %57, %cst_41 [2] : vector<2x8x8xf32> to vector<2x8xf32>
    %59 = vector.shape_cast %58 : vector<2x8xf32> to vector<2x8x1xf32>
    %60 = vector.broadcast %59 : vector<2x8x1xf32> to vector<2x8x8xf32>
    %61 = arith.subf %57, %60 : vector<2x8x8xf32>
    %62 = math.exp %61 : vector<2x8x8xf32>
    %cst_42 = arith.constant dense<0.000000e+00> : vector<2x8xf32>
    %63 = vector.multi_reduction <add>, %62, %cst_42 [2] : vector<2x8x8xf32> to vector<2x8xf32>
    %64 = vector.shape_cast %63 : vector<2x8xf32> to vector<2x8x1xf32>
    %65 = tpu.reciprocal %64 {approx = true} : vector<2x8x1xf32> -> vector<2x8x1xf32>
    %66 = vector.broadcast %65 : vector<2x8x1xf32> to vector<2x8x8xf32>
    %67 = arith.mulf %62, %66 : vector<2x8x8xf32>
    "tpu.trace_start"() <{level = 10 : i32, message = "hqk,hkd->hqd"}> : () -> ()
    %cst_43 = arith.constant dense<0.000000e+00> : vector<2x8x16xf32>
    %68 = tpu.matmul %67, %51, %cst_43 {dimension_numbers = #tpu.dot_dimension_numbers<[2], [1], [1], [2], [0, 0, 0, 1, 1, 2], [0], [0]>} : vector<2x8x8xf32>, vector<2x8x16xf32>, vector<2x8x16xf32> -> vector<2x8x16xf32>
    "tpu.trace_stop"() : () -> ()
    %69 = vector.extract_strided_slice %68 {offsets = [0, 0, 0], sizes = [1, 8, 16], strides = [1, 1, 1]} : vector<2x8x16xf32> to vector<1x8x16xf32>
    %70 = vector.shape_cast %69 : vector<1x8x16xf32> to vector<8x16xf32>
    %71 = vector.extract_strided_slice %68 {offsets = [1, 0, 0], sizes = [1, 8, 16], strides = [1, 1, 1]} : vector<2x8x16xf32> to vector<1x8x16xf32>
    %72 = vector.shape_cast %71 : vector<1x8x16xf32> to vector<8x16xf32>
    %73 = tpu.concatenate %70, %72 in 1 : vector<8x16xf32>, vector<8x16xf32> -> vector<8x32xf32>
    %cst_44 = arith.constant dense<0.000000e+00> : vector<8x32xf32>
    %74 = tpu.matmul %73, %24, %cst_44 {dimension_numbers = #tpu.dot_dimension_numbers<[1], [0], [0], [1], [0, 0, 1, 1], [], []>} : vector<8x32xf32>, vector<32x32xf32>, vector<8x32xf32> -> vector<8x32xf32>
    %75 = vector.broadcast %25 : vector<1x32xf32> to vector<8x32xf32>
    %76 = arith.addf %74, %75 : vector<8x32xf32>
    %77 = arith.addf %76, %1 : vector<8x32xf32>
    %cst_45 = arith.constant dense<0.000000e+00> : vector<8xf32>
    %78 = vector.multi_reduction <add>, %77, %cst_45 [1] : vector<8x32xf32> to vector<8xf32>
    %79 = vector.shape_cast %78 : vector<8xf32> to vector<8x1xf32>
    %cst_46 = arith.constant 3.200000e+01 : f32
    %80 = vector.broadcast %cst_46 : f32 to vector<8x1xf32>
    %81 = arith.divf %79, %80 : vector<8x1xf32>
    %82 = arith.mulf %77, %77 : vector<8x32xf32>
    %cst_47 = arith.constant dense<0.000000e+00> : vector<8xf32>
    %83 = vector.multi_reduction <add>, %82, %cst_47 [1] : vector<8x32xf32> to vector<8xf32>
    %84 = vector.shape_cast %83 : vector<8xf32> to vector<8x1xf32>
    %cst_48 = arith.constant 3.200000e+01 : f32
    %85 = vector.broadcast %cst_48 : f32 to vector<8x1xf32>
    %86 = arith.divf %84, %85 : vector<8x1xf32>
    %87 = arith.mulf %81, %81 : vector<8x1xf32>
    %88 = arith.subf %86, %87 : vector<8x1xf32>
    %89 = vector.broadcast %81 : vector<8x1xf32> to vector<8x32xf32>
    %90 = arith.subf %77, %89 : vector<8x32xf32>
    %cst_49 = arith.constant 9.99999974E-6 : f32
    %91 = vector.broadcast %cst_49 : f32 to vector<8x1xf32>
    %92 = arith.addf %88, %91 : vector<8x1xf32>
    %93 = math.rsqrt %92 : vector<8x1xf32>
    %94 = vector.broadcast %93 : vector<8x1xf32> to vector<8x32xf32>
    %95 = arith.mulf %90, %94 : vector<8x32xf32>
    %96 = vector.broadcast %26 : vector<1x32xf32> to vector<8x32xf32>
    %97 = arith.mulf %95, %96 : vector<8x32xf32>
    %98 = vector.broadcast %27 : vector<1x32xf32> to vector<8x32xf32>
    %99 = arith.addf %97, %98 : vector<8x32xf32>
    %100 = vector.shape_cast %67 : vector<2x8x8xf32> to vector<2x1x8x8xf32>
    %c0_50 = arith.constant 0 : index
    %c0_51 = arith.constant 0 : index
    %c0_52 = arith.constant 0 : index
    %c0_53 = arith.constant 0 : index
    %101 = vector.load %arg32[%c0_50, %c0_51, %c0_52, %c0_53] : memref<2x1x8x8xf32, #tpu.memory_space<vmem>>, vector<2x1x8x8xf32>
    tpu.vector_store %arg32[%c0_50, %c0_51, %c0_52, %c0_53], %100 {strides = array<i32>} : memref<2x1x8x8xf32, #tpu.memory_space<vmem>>, vector<2x1x8x8xf32>,
    %c0_54 = arith.constant 0 : index
    %c0_55 = arith.constant 0 : index
    %102 = vector.load %arg15[%c0_54, %c0_55] : memref<32x32xf32, #tpu.memory_space<vmem>>, vector<32x32xf32>
    %c0_56 = arith.constant 0 : index
    %c0_57 = arith.constant 0 : index
    %103 = vector.load %arg16[%c0_56, %c0_57] : memref<1x32xf32, #tpu.memory_space<vmem>>, vector<1x32xf32>
    %c0_58 = arith.constant 0 : index
    %c0_59 = arith.constant 0 : index
    %104 = vector.load %arg17[%c0_58, %c0_59] : memref<32x32xf32, #tpu.memory_space<vmem>>, vector<32x32xf32>
    %c0_60 = arith.constant 0 : index
    %c0_61 = arith.constant 0 : index
    %105 = vector.load %arg18[%c0_60, %c0_61] : memref<1x32xf32, #tpu.memory_space<vmem>>, vector<1x32xf32>
    %c0_62 = arith.constant 0 : index
    %c0_63 = arith.constant 0 : index
    %106 = vector.load %arg19[%c0_62, %c0_63] : memref<32x32xf32, #tpu.memory_space<vmem>>, vector<32x32xf32>
    %c0_64 = arith.constant 0 : index
    %c0_65 = arith.constant 0 : index
    %107 = vector.load %arg20[%c0_64, %c0_65] : memref<1x32xf32, #tpu.memory_space<vmem>>, vector<1x32xf32>
    %c0_66 = arith.constant 0 : index
    %c0_67 = arith.constant 0 : index
    %108 = vector.load %arg21[%c0_66, %c0_67] : memref<32x32xf32, #tpu.memory_space<vmem>>, vector<32x32xf32>
    %c0_68 = arith.constant 0 : index
    %c0_69 = arith.constant 0 : index
    %109 = vector.load %arg22[%c0_68, %c0_69] : memref<1x32xf32, #tpu.memory_space<vmem>>, vector<1x32xf32>
    %c0_70 = arith.constant 0 : index
    %c0_71 = arith.constant 0 : index
    %110 = vector.load %arg23[%c0_70, %c0_71] : memref<1x32xf32, #tpu.memory_space<vmem>>, vector<1x32xf32>
    %c0_72 = arith.constant 0 : index
    %c0_73 = arith.constant 0 : index
    %111 = vector.load %arg24[%c0_72, %c0_73] : memref<1x32xf32, #tpu.memory_space<vmem>>, vector<1x32xf32>
    %cst_74 = arith.constant dense<0.000000e+00> : vector<8x32xf32>
    %112 = tpu.matmul %99, %102, %cst_74 {dimension_numbers = #tpu.dot_dimension_numbers<[1], [0], [0], [1], [0, 0, 1, 1], [], []>} : vector<8x32xf32>, vector<32x32xf32>, vector<8x32xf32> -> vector<8x32xf32>
    %113 = vector.broadcast %103 : vector<1x32xf32> to vector<8x32xf32>
    %114 = arith.addf %112, %113 : vector<8x32xf32>
    %cst_75 = arith.constant dense<0.000000e+00> : vector<8x32xf32>
    %115 = tpu.matmul %3, %104, %cst_75 {dimension_numbers = #tpu.dot_dimension_numbers<[1], [0], [0], [1], [0, 0, 1, 1], [], []>} : vector<8x32xf32>, vector<32x32xf32>, vector<8x32xf32> -> vector<8x32xf32>
    %116 = vector.broadcast %105 : vector<1x32xf32> to vector<8x32xf32>
    %117 = arith.addf %115, %116 : vector<8x32xf32>
    %cst_76 = arith.constant dense<0.000000e+00> : vector<8x32xf32>
    %118 = tpu.matmul %3, %106, %cst_76 {dimension_numbers = #tpu.dot_dimension_numbers<[1], [0], [0], [1], [0, 0, 1, 1], [], []>} : vector<8x32xf32>, vector<32x32xf32>, vector<8x32xf32> -> vector<8x32xf32>
    %119 = vector.broadcast %107 : vector<1x32xf32> to vector<8x32xf32>
    %120 = arith.addf %118, %119 : vector<8x32xf32>
    %121 = vector.extract_strided_slice %114 {offsets = [0, 0], sizes = [8, 16], strides = [1, 1]} : vector<8x32xf32> to vector<8x16xf32>
    %122 = vector.extract_strided_slice %114 {offsets = [0, 16], sizes = [8, 16], strides = [1, 1]} : vector<8x32xf32> to vector<8x16xf32>
    %123 = vector.shape_cast %121 : vector<8x16xf32> to vector<1x8x16xf32>
    %124 = vector.shape_cast %122 : vector<8x16xf32> to vector<1x8x16xf32>
    %125 = tpu.concatenate %123, %124 in 0 : vector<1x8x16xf32>, vector<1x8x16xf32> -> vector<2x8x16xf32>
    %126 = vector.extract_strided_slice %117 {offsets = [0, 0], sizes = [8, 16], strides = [1, 1]} : vector<8x32xf32> to vector<8x16xf32>
    %127 = vector.extract_strided_slice %117 {offsets = [0, 16], sizes = [8, 16], strides = [1, 1]} : vector<8x32xf32> to vector<8x16xf32>
    %128 = vector.shape_cast %126 : vector<8x16xf32> to vector<1x8x16xf32>
    %129 = vector.shape_cast %127 : vector<8x16xf32> to vector<1x8x16xf32>
    %130 = tpu.concatenate %128, %129 in 0 : vector<1x8x16xf32>, vector<1x8x16xf32> -> vector<2x8x16xf32>
    %131 = vector.extract_strided_slice %120 {offsets = [0, 0], sizes = [8, 16], strides = [1, 1]} : vector<8x32xf32> to vector<8x16xf32>
    %132 = vector.extract_strided_slice %120 {offsets = [0, 16], sizes = [8, 16], strides = [1, 1]} : vector<8x32xf32> to vector<8x16xf32>
    %133 = vector.shape_cast %131 : vector<8x16xf32> to vector<1x8x16xf32>
    %134 = vector.shape_cast %132 : vector<8x16xf32> to vector<1x8x16xf32>
    %135 = tpu.concatenate %133, %134 in 0 : vector<1x8x16xf32>, vector<1x8x16xf32> -> vector<2x8x16xf32>
    "tpu.trace_start"() <{level = 10 : i32, message = "hqd,hkd->hqk"}> : () -> ()
    %cst_77 = arith.constant dense<0.000000e+00> : vector<2x8x8xf32>
    %136 = tpu.matmul %125, %130, %cst_77 {dimension_numbers = #tpu.dot_dimension_numbers<[2], [2], [1], [1], [0, 0, 0, 1, 1, 1], [0], [0]>} : vector<2x8x16xf32>, vector<2x8x16xf32>, vector<2x8x8xf32> -> vector<2x8x8xf32>
    "tpu.trace_stop"() : () -> ()
    %cst_78 = arith.constant 2.500000e-01 : f32
    %137 = vector.broadcast %cst_78 : f32 to vector<2x8x8xf32>
    %138 = arith.mulf %136, %137 : vector<2x8x8xf32>
    %139 = vector.shape_cast %17 : vector<8x8xf32> to vector<1x8x8xf32>
    %140 = vector.broadcast %139 : vector<1x8x8xf32> to vector<2x8x8xf32>
    %141 = arith.addf %138, %140 : vector<2x8x8xf32>
    %cst_79 = arith.constant dense<0xFF800000> : vector<2x8xf32>
    %142 = vector.multi_reduction <maximumf>, %141, %cst_79 [2] : vector<2x8x8xf32> to vector<2x8xf32>
    %143 = vector.shape_cast %142 : vector<2x8xf32> to vector<2x8x1xf32>
    %144 = vector.broadcast %143 : vector<2x8x1xf32> to vector<2x8x8xf32>
    %145 = arith.subf %141, %144 : vector<2x8x8xf32>
    %146 = math.exp %145 : vector<2x8x8xf32>
    %cst_80 = arith.constant dense<0.000000e+00> : vector<2x8xf32>
    %147 = vector.multi_reduction <add>, %146, %cst_80 [2] : vector<2x8x8xf32> to vector<2x8xf32>
    %148 = vector.shape_cast %147 : vector<2x8xf32> to vector<2x8x1xf32>
    %149 = tpu.reciprocal %148 {approx = true} : vector<2x8x1xf32> -> vector<2x8x1xf32>
    %150 = vector.broadcast %149 : vector<2x8x1xf32> to vector<2x8x8xf32>
    %151 = arith.mulf %146, %150 : vector<2x8x8xf32>
    "tpu.trace_start"() <{level = 10 : i32, message = "hqk,hkd->hqd"}> : () -> ()
    %cst_81 = arith.constant dense<0.000000e+00> : vector<2x8x16xf32>
    %152 = tpu.matmul %151, %135, %cst_81 {dimension_numbers = #tpu.dot_dimension_numbers<[2], [1], [1], [2], [0, 0, 0, 1, 1, 2], [0], [0]>} : vector<2x8x8xf32>, vector<2x8x16xf32>, vector<2x8x16xf32> -> vector<2x8x16xf32>
    "tpu.trace_stop"() : () -> ()
    %153 = vector.extract_strided_slice %152 {offsets = [0, 0, 0], sizes = [1, 8, 16], strides = [1, 1, 1]} : vector<2x8x16xf32> to vector<1x8x16xf32>
    %154 = vector.shape_cast %153 : vector<1x8x16xf32> to vector<8x16xf32>
    %155 = vector.extract_strided_slice %152 {offsets = [1, 0, 0], sizes = [1, 8, 16], strides = [1, 1, 1]} : vector<2x8x16xf32> to vector<1x8x16xf32>
    %156 = vector.shape_cast %155 : vector<1x8x16xf32> to vector<8x16xf32>
    %157 = tpu.concatenate %154, %156 in 1 : vector<8x16xf32>, vector<8x16xf32> -> vector<8x32xf32>
    %cst_82 = arith.constant dense<0.000000e+00> : vector<8x32xf32>
    %158 = tpu.matmul %157, %108, %cst_82 {dimension_numbers = #tpu.dot_dimension_numbers<[1], [0], [0], [1], [0, 0, 1, 1], [], []>} : vector<8x32xf32>, vector<32x32xf32>, vector<8x32xf32> -> vector<8x32xf32>
    %159 = vector.broadcast %109 : vector<1x32xf32> to vector<8x32xf32>
    %160 = arith.addf %158, %159 : vector<8x32xf32>
    %161 = arith.addf %160, %99 : vector<8x32xf32>
    %cst_83 = arith.constant dense<0.000000e+00> : vector<8xf32>
    %162 = vector.multi_reduction <add>, %161, %cst_83 [1] : vector<8x32xf32> to vector<8xf32>
    %163 = vector.shape_cast %162 : vector<8xf32> to vector<8x1xf32>
    %cst_84 = arith.constant 3.200000e+01 : f32
    %164 = vector.broadcast %cst_84 : f32 to vector<8x1xf32>
    %165 = arith.divf %163, %164 : vector<8x1xf32>
    %166 = arith.mulf %161, %161 : vector<8x32xf32>
    %cst_85 = arith.constant dense<0.000000e+00> : vector<8xf32>
    %167 = vector.multi_reduction <add>, %166, %cst_85 [1] : vector<8x32xf32> to vector<8xf32>
    %168 = vector.shape_cast %167 : vector<8xf32> to vector<8x1xf32>
    %cst_86 = arith.constant 3.200000e+01 : f32
    %169 = vector.broadcast %cst_86 : f32 to vector<8x1xf32>
    %170 = arith.divf %168, %169 : vector<8x1xf32>
    %171 = arith.mulf %165, %165 : vector<8x1xf32>
    %172 = arith.subf %170, %171 : vector<8x1xf32>
    %173 = vector.broadcast %165 : vector<8x1xf32> to vector<8x32xf32>
    %174 = arith.subf %161, %173 : vector<8x32xf32>
    %cst_87 = arith.constant 9.99999974E-6 : f32
    %175 = vector.broadcast %cst_87 : f32 to vector<8x1xf32>
    %176 = arith.addf %172, %175 : vector<8x1xf32>
    %177 = math.rsqrt %176 : vector<8x1xf32>
    %178 = vector.broadcast %177 : vector<8x1xf32> to vector<8x32xf32>
    %179 = arith.mulf %174, %178 : vector<8x32xf32>
    %180 = vector.broadcast %110 : vector<1x32xf32> to vector<8x32xf32>
    %181 = arith.mulf %179, %180 : vector<8x32xf32>
    %182 = vector.broadcast %111 : vector<1x32xf32> to vector<8x32xf32>
    %183 = arith.addf %181, %182 : vector<8x32xf32>
    %184 = vector.shape_cast %151 : vector<2x8x8xf32> to vector<2x1x8x8xf32>
    %c0_88 = arith.constant 0 : index
    %c0_89 = arith.constant 0 : index
    %c0_90 = arith.constant 0 : index
    %c0_91 = arith.constant 0 : index
    %185 = vector.load %arg33[%c0_88, %c0_89, %c0_90, %c0_91] : memref<2x1x8x8xf32, #tpu.memory_space<vmem>>, vector<2x1x8x8xf32>
    tpu.vector_store %arg33[%c0_88, %c0_89, %c0_90, %c0_91], %184 {strides = array<i32>} : memref<2x1x8x8xf32, #tpu.memory_space<vmem>>, vector<2x1x8x8xf32>,
    %c0_92 = arith.constant 0 : index
    %c0_93 = arith.constant 0 : index
    %186 = vector.load %arg25[%c0_92, %c0_93] : memref<32x64xf32, #tpu.memory_space<vmem>>, vector<32x64xf32>
    %cst_94 = arith.constant dense<0.000000e+00> : vector<8x64xf32>
    %187 = tpu.matmul %183, %186, %cst_94 {dimension_numbers = #tpu.dot_dimension_numbers<[1], [0], [0], [1], [0, 0, 1, 1], [], []>} : vector<8x32xf32>, vector<32x64xf32>, vector<8x64xf32> -> vector<8x64xf32>
    %c0_95 = arith.constant 0 : index
    %c0_96 = arith.constant 0 : index
    %188 = vector.load %arg26[%c0_95, %c0_96] : memref<1x64xf32, #tpu.memory_space<vmem>>, vector<1x64xf32>
    %189 = vector.broadcast %188 : vector<1x64xf32> to vector<8x64xf32>
    %190 = arith.addf %187, %189 : vector<8x64xf32>
    %cst_97 = arith.constant 0.000000e+00 : f32
    %191 = vector.broadcast %cst_97 : f32 to vector<8x64xf32>
    %192 = arith.maximumf %190, %191 : vector<8x64xf32>
    %c0_98 = arith.constant 0 : index
    %c0_99 = arith.constant 0 : index
    %193 = vector.load %arg27[%c0_98, %c0_99] : memref<64x32xf32, #tpu.memory_space<vmem>>, vector<64x32xf32>
    %cst_100 = arith.constant dense<0.000000e+00> : vector<8x32xf32>
    %194 = tpu.matmul %192, %193, %cst_100 {dimension_numbers = #tpu.dot_dimension_numbers<[1], [0], [0], [1], [0, 0, 1, 1], [], []>} : vector<8x64xf32>, vector<64x32xf32>, vector<8x32xf32> -> vector<8x32xf32>
    %c0_101 = arith.constant 0 : index
    %c0_102 = arith.constant 0 : index
    %195 = vector.load %arg28[%c0_101, %c0_102] : memref<1x32xf32, #tpu.memory_space<vmem>>, vector<1x32xf32>
    %196 = vector.broadcast %195 : vector<1x32xf32> to vector<8x32xf32>
    %197 = arith.addf %194, %196 : vector<8x32xf32>
    %198 = arith.addf %197, %183 : vector<8x32xf32>
    %c0_103 = arith.constant 0 : index
    %c0_104 = arith.constant 0 : index
    %199 = vector.load %arg29[%c0_103, %c0_104] : memref<1x32xf32, #tpu.memory_space<vmem>>, vector<1x32xf32>
    %c0_105 = arith.constant 0 : index
    %c0_106 = arith.constant 0 : index
    %200 = vector.load %arg30[%c0_105, %c0_106] : memref<1x32xf32, #tpu.memory_space<vmem>>, vector<1x32xf32>
    %cst_107 = arith.constant dense<0.000000e+00> : vector<8xf32>
    %201 = vector.multi_reduction <add>, %198, %cst_107 [1] : vector<8x32xf32> to vector<8xf32>
    %202 = vector.shape_cast %201 : vector<8xf32> to vector<8x1xf32>
    %cst_108 = arith.constant 3.200000e+01 : f32
    %203 = vector.broadcast %cst_108 : f32 to vector<8x1xf32>
    %204 = arith.divf %202, %203 : vector<8x1xf32>
    %205 = arith.mulf %198, %198 : vector<8x32xf32>
    %cst_109 = arith.constant dense<0.000000e+00> : vector<8xf32>
    %206 = vector.multi_reduction <add>, %205, %cst_109 [1] : vector<8x32xf32> to vector<8xf32>
    %207 = vector.shape_cast %206 : vector<8xf32> to vector<8x1xf32>
    %cst_110 = arith.constant 3.200000e+01 : f32
    %208 = vector.broadcast %cst_110 : f32 to vector<8x1xf32>
    %209 = arith.divf %207, %208 : vector<8x1xf32>
    %210 = arith.mulf %204, %204 : vector<8x1xf32>
    %211 = arith.subf %209, %210 : vector<8x1xf32>
    %212 = vector.broadcast %204 : vector<8x1xf32> to vector<8x32xf32>
    %213 = arith.subf %198, %212 : vector<8x32xf32>
    %cst_111 = arith.constant 9.99999974E-6 : f32
    %214 = vector.broadcast %cst_111 : f32 to vector<8x1xf32>
    %215 = arith.addf %211, %214 : vector<8x1xf32>
    %216 = math.rsqrt %215 : vector<8x1xf32>
    %217 = vector.broadcast %216 : vector<8x1xf32> to vector<8x32xf32>
    %218 = arith.mulf %213, %217 : vector<8x32xf32>
    %219 = vector.broadcast %199 : vector<1x32xf32> to vector<8x32xf32>
    %220 = arith.mulf %218, %219 : vector<8x32xf32>
    %221 = vector.broadcast %200 : vector<1x32xf32> to vector<8x32xf32>
    %222 = arith.addf %220, %221 : vector<8x32xf32>
    %c0_112 = arith.constant 0 : index
    %c0_113 = arith.constant 0 : index
    %c0_114 = arith.constant 0 : index
    %223 = vector.load %arg31[%c0_112, %c0_113, %c0_114] : memref<1x8x32xf32, #tpu.memory_space<vmem>>, vector<1x8x32xf32>
    %224 = vector.shape_cast %223 : vector<1x8x32xf32> to vector<8x32xf32>
    %225 = vector.shape_cast %222 : vector<8x32xf32> to vector<1x8x32xf32>
    tpu.vector_store %arg31[%c0_112, %c0_113, %c0_114], %225 {strides = array<i32>} : memref<1x8x32xf32, #tpu.memory_space<vmem>>, vector<1x8x32xf32>,
    return
  }
  func.func @transform_0(%arg0: i32) -> (i32, i32, i32) {
    %c0_i32 = arith.constant 0 : i32
    %c0_i32_0 = arith.constant 0 : i32
    %c0_i32_1 = arith.constant 0 : i32
    return %arg0, %c0_i32, %c0_i32_0 : i32, i32, i32
  }
  func.func @transform_1(%arg0: i32) -> (i32, i32, i32) {
    %c0_i32 = arith.constant 0 : i32
    %c0_i32_0 = arith.constant 0 : i32
    %c0_i32_1 = arith.constant 0 : i32
    return %arg0, %c0_i32, %c0_i32_0 : i32, i32, i32
  }
  func.func @transform_2(%arg0: i32) -> (i32, i32, i32) {
    %c0_i32 = arith.constant 0 : i32
    %c0_i32_0 = arith.constant 0 : i32
    %c0_i32_1 = arith.constant 0 : i32
    return %arg0, %c0_i32, %c0_i32_0 : i32, i32, i32
  }
  func.func @transform_3(%arg0: i32) -> (i32, i32, i32) {
    %c0_i32 = arith.constant 0 : i32
    %c0_i32_0 = arith.constant 0 : i32
    %c0_i32_1 = arith.constant 0 : i32
    return %arg0, %c0_i32, %c0_i32_0 : i32, i32, i32
  }
  func.func @transform_4(%arg0: i32) -> (i32, i32) {
    %c0_i32 = arith.constant 0 : i32
    %c0_i32_0 = arith.constant 0 : i32
    %c0_i32_1 = arith.constant 0 : i32
    return %c0_i32, %c0_i32_0 : i32, i32
  }
  func.func @transform_5(%arg0: i32) -> (i32, i32) {
    %c0_i32 = arith.constant 0 : i32
    %c0_i32_0 = arith.constant 0 : i32
    %c0_i32_1 = arith.constant 0 : i32
    return %c0_i32, %c0_i32_0 : i32, i32
  }
  func.func @transform_6(%arg0: i32) -> (i32, i32) {
    %c0_i32 = arith.constant 0 : i32
    %c0_i32_0 = arith.constant 0 : i32
    %c0_i32_1 = arith.constant 0 : i32
    return %c0_i32, %c0_i32_0 : i32, i32
  }
  func.func @transform_7(%arg0: i32) -> (i32, i32) {
    %c0_i32 = arith.constant 0 : i32
    %c0_i32_0 = arith.constant 0 : i32
    %c0_i32_1 = arith.constant 0 : i32
    return %c0_i32, %c0_i32_0 : i32, i32
  }
  func.func @transform_8(%arg0: i32) -> (i32, i32) {
    %c0_i32 = arith.constant 0 : i32
    %c0_i32_0 = arith.constant 0 : i32
    %c0_i32_1 = arith.constant 0 : i32
    return %c0_i32, %c0_i32_0 : i32, i32
  }
  func.func @transform_9(%arg0: i32) -> (i32, i32) {
    %c0_i32 = arith.constant 0 : i32
    %c0_i32_0 = arith.constant 0 : i32
    %c0_i32_1 = arith.constant 0 : i32
    return %c0_i32, %c0_i32_0 : i32, i32
  }
  func.func @transform_10(%arg0: i32) -> (i32, i32) {
    %c0_i32 = arith.constant 0 : i32
    %c0_i32_0 = arith.constant 0 : i32
    %c0_i32_1 = arith.constant 0 : i32
    return %c0_i32, %c0_i32_0 : i32, i32
  }
  func.func @transform_11(%arg0: i32) -> (i32, i32) {
    %c0_i32 = arith.constant 0 : i32
    %c0_i32_0 = arith.constant 0 : i32
    %c0_i32_1 = arith.constant 0 : i32
    return %c0_i32, %c0_i32_0 : i32, i32
  }
  func.func @transform_12(%arg0: i32) -> (i32, i32) {
    %c0_i32 = arith.constant 0 : i32
    %c0_i32_0 = arith.constant 0 : i32
    %c0_i32_1 = arith.constant 0 : i32
    return %c0_i32, %c0_i32_0 : i32, i32
  }
  func.func @transform_13(%arg0: i32) -> (i32, i32) {
    %c0_i32 = arith.constant 0 : i32
    %c0_i32_0 = arith.constant 0 : i32
    %c0_i32_1 = arith.constant 0 : i32
    return %c0_i32, %c0_i32_0 : i32, i32
  }
  func.func @transform_14(%arg0: i32) -> (i32, i32) {
    %c0_i32 = arith.constant 0 : i32
    %c0_i32_0 = arith.constant 0 : i32
    %c0_i32_1 = arith.constant 0 : i32
    return %c0_i32, %c0_i32_0 : i32, i32
  }
  func.func @transform_15(%arg0: i32) -> (i32, i32) {
    %c0_i32 = arith.constant 0 : i32
    %c0_i32_0 = arith.constant 0 : i32
    %c0_i32_1 = arith.constant 0 : i32
    return %c0_i32, %c0_i32_0 : i32, i32
  }
  func.func @transform_16(%arg0: i32) -> (i32, i32) {
    %c0_i32 = arith.constant 0 : i32
    %c0_i32_0 = arith.constant 0 : i32
    %c0_i32_1 = arith.constant 0 : i32
    return %c0_i32, %c0_i32_0 : i32, i32
  }
  func.func @transform_17(%arg0: i32) -> (i32, i32) {
    %c0_i32 = arith.constant 0 : i32
    %c0_i32_0 = arith.constant 0 : i32
    %c0_i32_1 = arith.constant 0 : i32
    return %c0_i32, %c0_i32_0 : i32, i32
  }
  func.func @transform_18(%arg0: i32) -> (i32, i32) {
    %c0_i32 = arith.constant 0 : i32
    %c0_i32_0 = arith.constant 0 : i32
    %c0_i32_1 = arith.constant 0 : i32
    return %c0_i32, %c0_i32_0 : i32, i32
  }
  func.func @transform_19(%arg0: i32) -> (i32, i32) {
    %c0_i32 = arith.constant 0 : i32
    %c0_i32_0 = arith.constant 0 : i32
    %c0_i32_1 = arith.constant 0 : i32
    return %c0_i32, %c0_i32_0 : i32, i32
  }
  func.func @transform_20(%arg0: i32) -> (i32, i32) {
    %c0_i32 = arith.constant 0 : i32
    %c0_i32_0 = arith.constant 0 : i32
    %c0_i32_1 = arith.constant 0 : i32
    return %c0_i32, %c0_i32_0 : i32, i32
  }
  func.func @transform_21(%arg0: i32) -> (i32, i32) {
    %c0_i32 = arith.constant 0 : i32
    %c0_i32_0 = arith.constant 0 : i32
    %c0_i32_1 = arith.constant 0 : i32
    return %c0_i32, %c0_i32_0 : i32, i32
  }
  func.func @transform_22(%arg0: i32) -> (i32, i32) {
    %c0_i32 = arith.constant 0 : i32
    %c0_i32_0 = arith.constant 0 : i32
    %c0_i32_1 = arith.constant 0 : i32
    return %c0_i32, %c0_i32_0 : i32, i32
  }
  func.func @transform_23(%arg0: i32) -> (i32, i32) {
    %c0_i32 = arith.constant 0 : i32
    %c0_i32_0 = arith.constant 0 : i32
    %c0_i32_1 = arith.constant 0 : i32
    return %c0_i32, %c0_i32_0 : i32, i32
  }
  func.func @transform_24(%arg0: i32) -> (i32, i32) {
    %c0_i32 = arith.constant 0 : i32
    %c0_i32_0 = arith.constant 0 : i32
    %c0_i32_1 = arith.constant 0 : i32
    return %c0_i32, %c0_i32_0 : i32, i32
  }
  func.func @transform_25(%arg0: i32) -> (i32, i32) {
    %c0_i32 = arith.constant 0 : i32
    %c0_i32_0 = arith.constant 0 : i32
    %c0_i32_1 = arith.constant 0 : i32
    return %c0_i32, %c0_i32_0 : i32, i32
  }
  func.func @transform_26(%arg0: i32) -> (i32, i32) {
    %c0_i32 = arith.constant 0 : i32
    %c0_i32_0 = arith.constant 0 : i32
    %c0_i32_1 = arith.constant 0 : i32
    return %c0_i32, %c0_i32_0 : i32, i32
  }
  func.func @transform_27(%arg0: i32) -> (i32, i32) {
    %c0_i32 = arith.constant 0 : i32
    %c0_i32_0 = arith.constant 0 : i32
    %c0_i32_1 = arith.constant 0 : i32
    return %c0_i32, %c0_i32_0 : i32, i32
  }
  func.func @transform_28(%arg0: i32) -> (i32, i32) {
    %c0_i32 = arith.constant 0 : i32
    %c0_i32_0 = arith.constant 0 : i32
    %c0_i32_1 = arith.constant 0 : i32
    return %c0_i32, %c0_i32_0 : i32, i32
  }
  func.func @transform_29(%arg0: i32) -> (i32, i32) {
    %c0_i32 = arith.constant 0 : i32
    %c0_i32_0 = arith.constant 0 : i32
    %c0_i32_1 = arith.constant 0 : i32
    return %c0_i32, %c0_i32_0 : i32, i32
  }
  func.func @transform_30(%arg0: i32) -> (i32, i32, i32) {
    %c0_i32 = arith.constant 0 : i32
    %c0_i32_0 = arith.constant 0 : i32
    %c0_i32_1 = arith.constant 0 : i32
    return %arg0, %c0_i32, %c0_i32_0 : i32, i32, i32
  }
  func.func @transform_31(%arg0: i32) -> (i32, i32, i32, i32) {
    %c0_i32 = arith.constant 0 : i32
    %c0_i32_0 = arith.constant 0 : i32
    %c0_i32_1 = arith.constant 0 : i32
    %c0_i32_2 = arith.constant 0 : i32
    return %c0_i32, %arg0, %c0_i32_0, %c0_i32_1 : i32, i32, i32, i32
  }
  func.func @transform_32(%arg0: i32) -> (i32, i32, i32, i32) {
    %c0_i32 = arith.constant 0 : i32
    %c0_i32_0 = arith.constant 0 : i32
    %c0_i32_1 = arith.constant 0 : i32
    %c0_i32_2 = arith.constant 0 : i32
    return %c0_i32, %arg0, %c0_i32_0, %c0_i32_1 : i32, i32, i32, i32
  }
}

</mosaic_0001>

<bundles_post_ra>
// kernel: tpu_custom_call.1
= control target key start
LH: loop header
LB: loop body
LE: loop exit
PB: predicated region body
PF: predicated region fallthrough
CT: control target
= control target key end

     0   :  { %s4625_s6 = smov 1   ;;  %s4626_s10 = smov 2   ;;  %s5588_s0 = inlined_call_operand.smem [shape: u32[33], index: -1, kind: input, shape index: {}] }
   0x1   :  { %s4695_s5 = sld [smem:[%s5588_s0]]   ;;  %s4627_s14 = smov 3  }
   0x2   :  { %s4700_s9 = sld [smem:[%s5588_s0 + %s4625_s6]]   ;;  %s4628_s18 = smov 4  }
   0x3   :  { %s4705_s13 = sld [smem:[%s5588_s0 + %s4626_s10]]   ;;  %s4629_s22 = smov 5  }
   0x4   :  { %s4710_s17 = sld [smem:[%s5588_s0 + %s4627_s14]]   ;;  %s4630_s26 = smov 6  }
   0x5   :  { %s4715_s21 = sld [smem:[%s5588_s0 + %s4628_s18]]   ;;  %s4631_s30 = smov 7  }
   0x6   :  { %s4720_s25 = sld [smem:[%s5588_s0 + %s4629_s22]]   ;;  %s4632_s4 = smov 8  }
   0x7   :  { %5635 = sst [smem:[#allocation45_spill]] %s4695_s5  ;;  %s4633_s10 = smov 9  }
   0x8   :  { %5636 = sst [smem:[#allocation46_spill]] %s4700_s9  ;;  %s4634_s15 = smov 10  }
   0x9   :  { %5637 = sst [smem:[#allocation47_spill]] %s4705_s13  ;;  %s4635_s20 = smov 11  }
   0xa   :  { %5638 = sst [smem:[#allocation48_spill]] %s4710_s17  ;;  %s4637_s1 = smov 13  }
   0xb   :  { %5639 = sst [smem:[#allocation49_spill]] %s4715_s21  ;;  %s4638_s7 = smov 14  }
   0xc   :  { %5640 = sst [smem:[#allocation50_spill]] %s4720_s25  ;;  %s4640_s22 = smov 16  }
   0xd   :  { %s4725_s29 = sld [smem:[%s5588_s0 + %s4630_s26]]   ;;  %s4636_s26 = smov 12  }
   0xe   :  { %s4730_s3 = sld [smem:[%s5588_s0 + %s4631_s30]]   ;;  %s4641_s28 = smov 17  }
   0xf   :  { %s4735_s8 = sld [smem:[%s5588_s0 + %s4632_s4]]  }
  0x10   :  { %s4740_s14 = sld [smem:[%s5588_s0 + %s4633_s10]]  }
  0x11   :  { %s4745_s19 = sld [smem:[%s5588_s0 + %s4634_s15]]   ;;  %s4639_s15 = smov 15  }
  0x12   :  { %s4750_s24 = sld [smem:[%s5588_s0 + %s4635_s20]]  }
  0x13   :  { %5641 = sst [smem:[#allocation51_spill]] %s4725_s29 }
  0x14   :  { %5642 = sst [smem:[#allocation52_spill]] %s4730_s3 }
  0x15   :  { %5643 = sst [smem:[#allocation53_spill]] %s4735_s8 }
  0x16   :  { %s4755_s30 = sld [smem:[%s5588_s0 + %s4636_s26]]  }
  0x17   :  { %5644 = sst [smem:[#allocation54_spill]] %s4745_s19 }
  0x18   :  { %5645 = sst [smem:[#allocation55_spill]] %s4750_s24 }
  0x19   :  { %s4760_s6 = sld [smem:[%s5588_s0 + %s4637_s1]]  }
  0x1a   :  { %s4765_s12 = sld [smem:[%s5588_s0 + %s4638_s7]]   ;;  %s4642_s7 = smov 18  }
  0x1b   :  { %s4770_s20 = sld [smem:[%s5588_s0 + %s4639_s15]]   ;;  %s4643_s15 = smov 19  }
  0x1c   :  { %s4775_s27 = sld [smem:[%s5588_s0 + %s4640_s22]]   ;;  %s4644_s22 = smov 20  }
  0x1d   :  { %s4780_s4 = sld [smem:[%s5588_s0 + %s4641_s28]]   ;;  %s4645_s28 = smov 21  }
  0x1e   :  { %s4785_s19 = sld [smem:[%s5588_s0 + %s4642_s7]]   ;;  %s4646_s7 = smov 22  }
  0x1f   :  { %5646 = sst [smem:[#allocation56_spill]] %s4760_s6 }
  0x20   :  { %5647 = sst [smem:[#allocation57_spill]] %s4765_s12 }
  0x21   :  { %5648 = sst [smem:[#allocation58_spill]] %s4770_s20 }
  0x22   :  { %s4790_s8 = sld [smem:[%s5588_s0 + %s4643_s15]]   ;;  %s4647_s15 = smov 23  }
  0x23   :  { %5649 = sst [smem:[#allocation59_spill]] %s4780_s4 }
  0x24   :  { %s4795_s29 = sld [smem:[%s5588_s0 + %s4644_s22]]   ;;  %s4648_s22 = smov 24  }
  0x25   :  { %s4800_s21 = sld [smem:[%s5588_s0 + %s4645_s28]]   ;;  %s4649_s28 = smov 25  }
  0x26   :  { %s4805_s17 = sld [smem:[%s5588_s0 + %s4646_s7]]   ;;  %s4650_s7 = smov 26  }
  0x27   :  { %s4815_s13 = sld [smem:[%s5588_s0 + %s4648_s22]]   ;;  %s4652_s22 = smov 28  }
  0x28   :  { %5650 = sst [smem:[#allocation60_spill]] %s4790_s8 }
  0x29   :  { %s4810_s8 = sld [smem:[%s5588_s0 + %s4647_s15]]   ;;  %s4651_s15 = smov 27  }
  0x2a   :  { %5651 = sst [smem:[#allocation61_spill]] %s4795_s29 }
  0x2b   :  { %5652 = sst [smem:[#allocation62_spill]] %s4800_s21 }
  0x2c   :  { %5653 = sst [smem:[#allocation63_spill]] %s4805_s17 }
  0x2d   :  { %5655 = sst [smem:[#allocation65_spill]] %s4815_s13 }
  0x2e   :  { %s4820_s21 = sld [smem:[%s5588_s0 + %s4649_s28]]   ;;  %s4653_s28 = smov 29  }
  0x2f   :  { %5654 = sst [smem:[#allocation64_spill]] %s4810_s8 }
  0x30   :  { %s4825_s17 = sld [smem:[%s5588_s0 + %s4650_s7]]   ;;  %s4654_s7 = smov 30  }
  0x31   :  { %s4830_s8 = sld [smem:[%s5588_s0 + %s4651_s15]]   ;;  %s4655_s15 = smov 31  }
  0x32   :  { %s4835_s5 = sld [smem:[%s5588_s0 + %s4652_s22]]   ;;  %s4656_s22 = smov 32  }
  0x34   :  { %5656 = sst [smem:[#allocation66_spill]] %s4820_s21 }
  0x35   :  { %s4840_s21 = sld [smem:[%s5588_s0 + %s4653_s28]]  }
  0x36   :  { %5657 = sst [smem:[#allocation67_spill]] %s4825_s17 }
  0x37   :  { %5658 = sst [smem:[#allocation68_spill]] %s4830_s8 }
  0x38   :  { %5659 = sst [smem:[#allocation69_spill]] %s4835_s5 }
  0x39   :  { %s4845_s17 = sld [smem:[%s5588_s0 + %s4654_s7]]  }
  0x3a   :  { %s4850_s8 = sld [smem:[%s5588_s0 + %s4655_s15]]  }
  0x3b   :  { %5660 = sst [smem:[#allocation70_spill]] %s4840_s21 }
  0x3c   :  { %s4855_s5 = sld [smem:[%s5588_s0 + %s4656_s22]]  }
  0x3f   :  { %5661 = sst [smem:[#allocation71_spill]] %s4845_s17 }
  0x40   :  { %5662 = sst [smem:[#allocation72_spill]] %s4850_s8 }
  0x41   :  { %71 = vsyncpa [#allocation3], 0 }
  0x42   :  { %73 = vsyncpa [#allocation3 + $0x1], 0 }
  0x43   :  { %74 = vsyncpa [#allocation6], 0 }
  0x44   :  { %76 = vsyncpa [#allocation6 + $0x1], 0 }
  0x45   :  { %77 = vsyncpa [#allocation9], 0 }
  0x46   :  { %79 = vsyncpa [#allocation9 + $0x1], 0 }
  0x47   :  { %80 = vsyncpa [#allocation12], 0 }
  0x48   :  { %81 = vsyncpa [#allocation15], 0 }
  0x49   :  { %82 = vsyncpa [#allocation18], 0 }
  0x4a   :  { %83 = vsyncpa [#allocation21], 0 }
  0x4b   :  { %84 = vsyncpa [#allocation24], 0 }
  0x4c   :  { %85 = vsyncpa [#allocation27], 0 }
  0x4d   :  { %86 = vsyncpa [#allocation4], 0 }
  0x4e   :  { %88 = vsyncpa [#allocation4 + $0x1], 0 }
  0x4f   :  { %89 = vsyncpa [#allocation31], 0 }
  0x50   :  { %91 = vsyncpa [#allocation31 + $0x1], 0  ;;  %s4857_s28 = smov 0   ;;  %s4859_s0 = smov 0  }
  0x51   :  { %s4861_s1 = smov 0   ;;  %s4863_s2 = smov 0  }
  0x52 LB: > { %s5663_s13 = sld [smem:[#allocation65_spill]]  ;;  %s5664_s8 = sld [smem:[#allocation72_spill]]  ;;  %s4619_s1 = sphi %s4861_s1, %s5742_s1   ;;  %s4615_s0 = sphi %s4859_s0, %s5741_s0   ;;  %s4611_s28 = sphi %s4857_s28, %s5740_s28   ;;  %s4623_s2 = sphi %s4863_s2, %s5738_s2  }
  0x53   : > { %s5665_s12 = sld [smem:[#allocation57_spill]]  ;;  %s5666_s9 = sld [smem:[#allocation46_spill]] }
  0x54   : > { %s5667_s29 = sld [smem:[#allocation61_spill]]  ;;  %s5668_s25 = sld [smem:[#allocation50_spill]] }
  0x55   : > { %s5669_s24 = sld [smem:[#allocation55_spill]]  ;;  %s5670_s20 = sld [smem:[#allocation58_spill]] }
  0x56   : > { %s5671_s6 = sld [smem:[#allocation56_spill]]  ;;  %s5672_s4 = sld [smem:[#allocation59_spill]] }
  0x57   : > { %s5673_s3 = sld [smem:[#allocation52_spill]]  ;;  %5674 = sst [smem:[#allocation73_spill]] %s4611_s28 }
  0x58   : > { %s4657_s7 = smov [#allocation10]   ;;  %s4878_s11 = sadd.s32 4294967295, %s4623_s2  }
  0x59   : > { %s846_s10 = sshll.u32 %s4657_s7, 4  ;;  %p3327_p0 = scmp.ge.s32.totalorder %s4623_s2, 1  ;;  %s4883_s10 = int_to_ptr.vmem [resolvable:$true] %s846_s10 }
  0x5a   : > { %p5598_p1 = scmp.eq.s32.totalorder %s4878_s11, 0  ;;  %p830_p2 = scmp.lt.s32.totalorder %s4623_s2, 3 }
  0x5b   : > { %s4658_s16 = smov [#allocation11]   ;;  %s4659_s22 = smov [#allocation14]  }
  0x5c   : > { %p4885_p3 = pnand %p3327_p0, %p830_p2  ;;  %s860_s18 = sshll.u32 %s4658_s16, 4  ;;  %s4892_s18 = int_to_ptr.vmem [resolvable:$true] %s860_s18 }
  0x5d   : > { %s888_s23 = sshll.u32 %s4659_s22, 4  ;;  %s4660_s7 = smov [#allocation17]   ;;  %s4900_s23 = int_to_ptr.vmem [resolvable:$true] %s888_s23 }
  0x5e   : > { %s5675_s15 = scalar_select %p4885_p3, 1, 0 }
  0x5f   : > { %p3777_p5 = pneg %p4885_p3  ;;  %s4902_s17 = sshll.u32 %s4660_s7, 4  ;;  %s911_s17 = int_to_ptr.vmem [resolvable:$true] %s4902_s17 }
  0x60   : > { %s3977_s21 = scalar_lea.hbm %s5668_s25, 16 }
  0x61   : > { %p4896_p6 = pnand %p3777_p5, %p5598_p1  ;;  %p3978_p7 = scmp.ne.s32.totalorder %s5668_s25, %s3977_s21 }
  0x62   : > { %p3984_p11 = scmp.lt.u32.totalorder %s3977_s21, %s5668_s25 }
  0x63   : > { %s5676_s26 = scalar_select %p4896_p6, 1, 0 }
  0x64   : > { %p4908_p8 = pneg %p4896_p6 }
  0x66   : > { %s5677_s16 = scalar_select %p4908_p8, 1, 0 }
  0x67   : > { %p3980_p9 = pnand %p4908_p8, %p3978_p7 }
  0x69   : > { %p3981_p10 = pneg %p3980_p9 }
  0x6b   : > { %p3986_p12 = pnand %p3984_p11, %p3981_p10 }
  0x6d   : > { %3989 = shalt.err (!%p3986_p12)
}
  0x6e   : > { %s3990_s22 = scalar_lea.vmem %s4883_s10, 16  ;;  %s3997_s7 = scalar_lea.vmem %s4883_s10, 32 }
  0x6f   : > { %p3991_p13 = scmp.ne.s32.totalorder %s4883_s10, %s3990_s22  ;;  %p3998_p5 = scmp.lt.s32.totalorder %s4883_s10, %s4883_s10 }
  0x70   : > { %p3999_p4 = scmp.lt.s32.totalorder %s3997_s7, %s3990_s22 }
  0x71   : > { %p3993_p0 = pnand %p3991_p13, %p4908_p8 }
  0x72   : > { %p4000_p1 = por %p3999_p4, %p3998_p5 }
  0x73   : > { %p3994_p2 = pneg %p3993_p0 }
  0x75   : > { %p4001_p7 = pnand %p4000_p1, %p3994_p2 }
  0x77   : > { %4004 = shalt.err (!%p4001_p7)
}
  0x78   : > { %3780 = dma.hbm_to_vmem [thread:$0]  (!%p4896_p6), %s5668_s25, 16, %s4883_s10, [#allocation9]  }
  0x79   : > { %s4005_s21 = scalar_lea.hbm %s5673_s3, 16 }
  0x7a   : > { %p4006_p9 = scmp.ne.s32.totalorder %s5673_s3, %s4005_s21  ;;  %p4012_p12 = scmp.lt.u32.totalorder %s4005_s21, %s5673_s3 }
  0x7c   : > { %p4008_p10 = pnand %p4006_p9, %p4908_p8 }
  0x7e   : > { %p4009_p11 = pneg %p4008_p10 }
  0x80   : > { %p4014_p13 = pnand %p4012_p12, %p4009_p11 }
  0x82   : > { %4017 = shalt.err (!%p4014_p13)
}
  0x83   : > { %s4018_s22 = scalar_lea.vmem %s4892_s18, 16  ;;  %s4025_s7 = scalar_lea.vmem %s4892_s18, 32 }
  0x84   : > { %p4019_p1 = scmp.ne.s32.totalorder %s4892_s18, %s4018_s22  ;;  %p4026_p2 = scmp.lt.s32.totalorder %s4892_s18, %s4892_s18 }
  0x85   : > { %p4027_p5 = scmp.lt.s32.totalorder %s4025_s7, %s4018_s22 }
  0x86   : > { %p4021_p4 = pnand %p4019_p1, %p4908_p8 }
  0x87   : > { %p4028_p7 = por %p4027_p5, %p4026_p2 }
  0x88   : > { %p4022_p0 = pneg %p4021_p4 }
  0x8a   : > { %p4029_p9 = pnand %p4028_p7, %p4022_p0 }
  0x8c   : > { %4032 = shalt.err (!%p4029_p9)
}
  0x8d   : > { %3783 = dma.hbm_to_vmem [thread:$0]  (!%p4896_p6), %s5673_s3, 16, %s4892_s18, [#allocation12]  }
  0x8e   : > { %s4033_s10 = scalar_lea.hbm %s5669_s24, 16 }
  0x8f   : > { %p4034_p10 = scmp.ne.s32.totalorder %s5669_s24, %s4033_s10  ;;  %p4040_p13 = scmp.lt.u32.totalorder %s4033_s10, %s5669_s24 }
  0x91   : > { %p4036_p11 = pnand %p4034_p10, %p4908_p8 }
  0x93   : > { %p4037_p12 = pneg %p4036_p11 }
  0x95   : > { %p4042_p1 = pnand %p4040_p13, %p4037_p12 }
  0x97   : > { %4045 = shalt.err (!%p4042_p1)
}
  0x98   : > { %s4046_s21 = scalar_lea.vmem %s4900_s23, 16  ;;  %s4053_s22 = scalar_lea.vmem %s4900_s23, 32 }
  0x99   : > { %p4047_p4 = scmp.ne.s32.totalorder %s4900_s23, %s4046_s21  ;;  %p4054_p5 = scmp.lt.s32.totalorder %s4900_s23, %s4900_s23 }
  0x9a   : > { %p4055_p7 = scmp.lt.s32.totalorder %s4053_s22, %s4046_s21 }
  0x9b   : > { %p4049_p0 = pnand %p4047_p4, %p4908_p8 }
  0x9c   : > { %p4056_p9 = por %p4055_p7, %p4054_p5 }
  0x9d   : > { %p4050_p2 = pneg %p4049_p0 }
  0x9f   : > { %p4057_p10 = pnand %p4056_p9, %p4050_p2 }
  0xa1   : > { %4060 = shalt.err (!%p4057_p10)
}
  0xa2   : > { %3789 = dma.hbm_to_vmem [thread:$0]  (!%p4896_p6), %s5669_s24, 16, %s4900_s23, [#allocation15]  }
  0xa3   : > { %s4661_s18 = smov [#allocation20]   ;;  %s4061_s10 = scalar_lea.hbm %s5671_s6, 16 }
  0xa4   : > { %s934_s7 = sshll.u32 %s4661_s18, 4  ;;  %p4062_p11 = scmp.ne.s32.totalorder %s5671_s6, %s4061_s10  ;;  %s935_s7 = int_to_ptr.vmem [resolvable:$true] %s934_s7 }
  0xa5   : > { %p4068_p1 = scmp.lt.u32.totalorder %s4061_s10, %s5671_s6 }
  0xa6   : > { %p4064_p12 = pnand %p4062_p11, %p4908_p8 }
  0xa8   : > { %p4065_p13 = pneg %p4064_p12 }
  0xaa   : > { %p4070_p4 = pnand %p4068_p1, %p4065_p13 }
  0xac   : > { %4073 = shalt.err (!%p4070_p4)
}
  0xad   : > { %s4074_s21 = scalar_lea.vmem %s911_s17, 16  ;;  %s4081_s22 = scalar_lea.vmem %s911_s17, 32 }
  0xae   : > { %p4075_p0 = scmp.ne.s32.totalorder %s911_s17, %s4074_s21  ;;  %p4082_p7 = scmp.lt.s32.totalorder %s911_s17, %s911_s17 }
  0xaf   : > { %p4083_p9 = scmp.lt.s32.totalorder %s4081_s22, %s4074_s21 }
  0xb0   : > { %p4077_p2 = pnand %p4075_p0, %p4908_p8 }
  0xb1   : > { %p4084_p10 = por %p4083_p9, %p4082_p7 }
  0xb2   : > { %p4078_p5 = pneg %p4077_p2 }
  0xb4   : > { %p4085_p3 = pnand %p4084_p10, %p4078_p5 }
  0xb6   : > { %4088 = shalt.err (!%p4085_p3)
}
  0xb7   : > { %3795 = dma.hbm_to_vmem [thread:$0]  (!%p4896_p6), %s5671_s6, 16, %s911_s17, [#allocation18]  }
  0xb8   : > { %s4089_s23 = scalar_lea.hbm %s5670_s20, 16 }
  0xb9   : > { %p4090_p11 = scmp.ne.s32.totalorder %s5670_s20, %s4089_s23  ;;  %p4096_p1 = scmp.lt.u32.totalorder %s4089_s23, %s5670_s20 }
  0xbb   : > { %p4092_p12 = pnand %p4090_p11, %p4908_p8 }
  0xbd   : > { %p4093_p13 = pneg %p4092_p12 }
  0xbf   : > { %p4098_p4 = pnand %p4096_p1, %p4093_p13 }
  0xc1   : > { %4101 = shalt.err (!%p4098_p4)
}
  0xc2   : > { %s4102_s18 = scalar_lea.vmem %s935_s7, 16  ;;  %s4109_s10 = scalar_lea.vmem %s935_s7, 32 }
  0xc3   : > { %p4103_p3 = scmp.ne.s32.totalorder %s935_s7, %s4102_s18  ;;  %p4110_p5 = scmp.lt.s32.totalorder %s935_s7, %s935_s7 }
  0xc4   : > { %p4111_p7 = scmp.lt.s32.totalorder %s4109_s10, %s4102_s18 }
  0xc5   : > { %p4105_p0 = pnand %p4103_p3, %p4908_p8 }
  0xc6   : > { %p4112_p9 = por %p4111_p7, %p4110_p5 }
  0xc7   : > { %p4106_p2 = pneg %p4105_p0 }
  0xc9   : > { %p4113_p10 = pnand %p4112_p9, %p4106_p2 }
  0xcb   : > { %4116 = shalt.err (!%p4113_p10)
}
  0xcc   : > { %3801 = dma.hbm_to_vmem [thread:$0]  (!%p4896_p6), %s5670_s20, 16, %s935_s7, [#allocation21]  }
  0xcd   : > { %s4662_s17 = smov [#allocation23]   ;;  %s4117_s22 = scalar_lea.hbm %s5672_s4, 16 }
  0xce   : > { %s958_s21 = sshll.u32 %s4662_s17, 4  ;;  %p4118_p11 = scmp.ne.s32.totalorder %s5672_s4, %s4117_s22  ;;  %s959_s21 = int_to_ptr.vmem [resolvable:$true] %s958_s21 }
  0xcf   : > { %p4124_p1 = scmp.lt.u32.totalorder %s4117_s22, %s5672_s4 }
  0xd0   : > { %p4120_p12 = pnand %p4118_p11, %p4908_p8 }
  0xd2   : > { %p4121_p13 = pneg %p4120_p12 }
  0xd4   : > { %p4126_p4 = pnand %p4124_p1, %p4121_p13 }
  0xd6   : > { %4129 = shalt.err (!%p4126_p4)
}
  0xd7   : > { %s4130_s23 = scalar_lea.vmem %s959_s21, 16  ;;  %s4137_s18 = scalar_lea.vmem %s959_s21, 32 }
  0xd8   : > { %p4131_p3 = scmp.ne.s32.totalorder %s959_s21, %s4130_s23  ;;  %p4138_p5 = scmp.lt.s32.totalorder %s959_s21, %s959_s21 }
  0xd9   : > { %p4139_p7 = scmp.lt.s32.totalorder %s4137_s18, %s4130_s23 }
  0xda   : > { %p4133_p0 = pnand %p4131_p3, %p4908_p8 }
  0xdb   : > { %p4140_p9 = por %p4139_p7, %p4138_p5 }
  0xdc   : > { %p4134_p2 = pneg %p4133_p0 }
  0xde   : > { %p4141_p10 = pnand %p4140_p9, %p4134_p2 }
  0xe0   : > { %4144 = shalt.err (!%p4141_p10)
}
  0xe1   : > { %3807 = dma.hbm_to_vmem [thread:$0]  (!%p4896_p6), %s5672_s4, 16, %s959_s21, [#allocation24]  }
  0xe2   : > { %s4663_s7 = smov [#allocation26]   ;;  %s4145_s17 = scalar_lea.hbm %s5667_s29, 512 }
  0xe3   : > { %s984_s10 = sshll.u32 %s4663_s7, 4  ;;  %p4146_p11 = scmp.ne.s32.totalorder %s5667_s29, %s4145_s17  ;;  %s985_s10 = int_to_ptr.vmem [resolvable:$true] %s984_s10 }
  0xe4   : > { %p4152_p1 = scmp.lt.u32.totalorder %s4145_s17, %s5667_s29 }
  0xe5   : > { %p4148_p12 = pnand %p4146_p11, %p4908_p8 }
  0xe7   : > { %p4149_p13 = pneg %p4148_p12 }
  0xe9   : > { %p4154_p4 = pnand %p4152_p1, %p4149_p13 }
  0xeb   : > { %4157 = shalt.err (!%p4154_p4)
}
  0xec   : > { %s4158_s22 = scalar_lea.vmem %s985_s10, 512  ;;  %p4166_p5 = scmp.lt.s32.totalorder %s985_s10, %s985_s10 }
  0xed   : > { %p4159_p3 = scmp.ne.s32.totalorder %s985_s10, %s4158_s22  ;;  %p4167_p7 = scmp.lt.s32.totalorder %s4158_s22, %s4158_s22 }
  0xef   : > { %p4161_p0 = pnand %p4159_p3, %p4908_p8  ;;  %p4168_p9 = por %p4167_p7, %p4166_p5 }
  0xf1   : > { %p4162_p2 = pneg %p4161_p0 }
  0xf3   : > { %p4169_p10 = pnand %p4168_p9, %p4162_p2 }
  0xf5   : > { %4172 = shalt.err (!%p4169_p10)
}
  0xf6   : > { %s5601_s21 = smov 128   ;;  %s5603_s23 = smov 8  }
  0xf7   : > { %3813 = dma.hbm_to_vmem [thread:$0]  (!%p4896_p6), %s5667_s29, 512, %s985_s10, [#allocation27], %s5601_s21, %s5601_s21, %s5603_s23  }
  0xf8   : > { %s5607_s18 = sadd.s32 4294967294, %s4623_s2   ;;  %s5004_s7 = sadd.s32 1, %s4623_s2  }
  0xf9   : > { %5678 = sst [smem:[#allocation74_spill]] %s5004_s7  ;;  %s104_s17 = sadd.s32 1, %s4619_s1 }
  0xfa   : > { %s101_s22 = ssub.s32 %s4623_s2, %s5004_s7  ;;  %p111_p11 = scmp.ne.s32.totalorder %s4619_s1, %s4615_s0 }
  0xfb   : > { %p102_p12 = scmp.eq.s32.totalorder %s101_s22, 0  ;;  %p112_p13 = scmp.eq.s32.totalorder %s4623_s2, 0 }
  0xfc   : > { %p117_p1 = scmp.ne.s32.totalorder %s4615_s0, %s4611_s28  ;;  %p765_p4 = scmp.eq.s32.totalorder %s4878_s11, 1 }
  0xfd   : > { %s5016_s3 = scalar_select %p102_p12, %s4619_s1, %s104_s17  }
  0xfe   : > { %p113_p3 = por %p112_p13, %p111_p11  ;;  %p5680_p0 = scmp.eq.s32.totalorder %s4878_s11, 0 }
  0xff   : > { %5679 = sst [smem:[#allocation75_spill]] %s5016_s3  ;;  %p5024_p5 = por %p765_p4, %p111_p11 }
 0x100   : > { %p5020_p2 = por %p5680_p0, %p117_p1  ;;  %p771_p7 = scmp.eq.s32.totalorder %s5607_s18, 1 }
 0x101   : > { %s5682_s21 = scalar_select %p5024_p5, 1, 0 }
 0x102   : > { %s5681_s10 = scalar_select %p5020_p2, 1, 0 }
 0x103   : > { %p3853_p9 = scmp.lt.s32.totalorder %s4623_s2, 2  ;;  %s5611_s22 = sand.u32 1, %s4619_s1  }
 0x104   : > { %p5032_p10 = por %p771_p7, %p117_p1  ;;  %s5038_s17 = sshll.u32 %s5611_s22, 3 }
 0x105   : > { %s5041_s4 = sshll.u32 %s4623_s2, 7  ;;  %p5043_p11 = pnand %p3853_p9, %p113_p3 }
 0x106   : > { %s5683_s23 = scalar_select %p5032_p10, 1, 0 }
 0x107   : > { %s5685_s6 = scalar_select %p5043_p11, 1, 0 }
 0x108   : > { %5684 = sst [smem:[#allocation76_spill]] %s5683_s23  ;;  %s5621_s18 = sand.u32 1, %s4623_s2  }
 0x109   : > { %s5050_s20 = scalar_lea.hbm %s5666_s9, %s5041_s4  ;;  %s1057_s24 = scalar_lea.vmem [#allocation5], %s5038_s17 }
 0x10a   : > { %s1064_s25 = sshll.u32 %s1057_s24, 4  ;;  %s5057_s22 = scalar_lea.sflag [#allocation6], %s5621_s18  ;;  %s5053_s25 = int_to_ptr.vmem [resolvable:$true] %s1064_s25 }
 0x10b   : > { %s4173_s29 = scalar_lea.hbm %s5050_s20, 128  ;;  %p5063_p13 = pneg %p5043_p11 }
 0x10c   : > { %p4174_p12 = scmp.ne.s32.totalorder %s5050_s20, %s4173_s29  ;;  %s4178_s7 = scalar_lea.hbm %s5666_s9, 256 }
 0x10d   : > { %s5686_s3 = scalar_select %p5063_p13, 1, 0 }
 0x10e   : > { %p4176_p1 = pnand %p5063_p13, %p4174_p12  ;;  %p4179_p3 = scmp.lt.u32.totalorder %s5050_s20, %s5666_s9 }
 0x10f   : > { %p4180_p0 = scmp.lt.u32.totalorder %s4178_s7, %s4173_s29  ;;  %p4182_p9 = scmp.lt.u32.totalorder %s4173_s29, %s5050_s20 }
 0x110   : > { %p4177_p4 = pneg %p4176_p1 }
 0x111   : > { %p4181_p7 = por %p4180_p0, %p4179_p3 }
 0x113   : > { %p4183_p10 = por %p4182_p9, %p4181_p7 }
 0x115   : > { %p4184_p5 = pnand %p4183_p10, %p4177_p4 }
 0x117   : > { %4187 = shalt.err (!%p4184_p5)
}
 0x118   : > { %s4188_s24 = scalar_lea.vmem %s5053_s25, 128  ;;  %s4666_s18 = smov [#allocation5]  }
 0x119   : > { %p4189_p2 = scmp.ne.s32.totalorder %s5053_s25, %s4188_s24  ;;  %s4193_s23 = sshll.u32 %s4666_s18, 4  ;;  %s4194_s23 = int_to_ptr.vmem [resolvable:$false] %s4193_s23 }
 0x11a   : > { %s4195_s28 = scalar_lea.vmem %s4194_s23, 256  ;;  %p4196_p12 = scmp.lt.s32.totalorder %s5053_s25, %s4194_s23 }
 0x11b   : > { %p4191_p6 = pnand %p4189_p2, %p5063_p13  ;;  %p4197_p1 = scmp.lt.s32.totalorder %s4195_s28, %s4188_s24 }
 0x11d   : > { %p4192_p8 = pneg %p4191_p6  ;;  %p4198_p3 = por %p4197_p1, %p4196_p12 }
 0x11f   : > { %p4199_p0 = pnand %p4198_p3, %p4192_p8 }
 0x121   : > { %4202 = shalt.err (!%p4199_p0)
}
 0x122   : > { %3823 = dma.hbm_to_vmem [thread:$0]  (!%p5043_p11), %s5050_s20, 128, %s5053_s25, %s5057_s22  }
 0x123   : > { %s4667_s29 = smov [#allocation13]   ;;  %s4668_s18 = smov [#allocation16]  }
 0x124   : > { %s874_s7 = sshll.u32 %s4667_s29, 4  ;;  %s899_s9 = sshll.u32 %s4668_s18, 4  ;;  %s875_s7 = int_to_ptr.vmem [resolvable:$true] %s874_s7  ;;  %s5083_s9 = int_to_ptr.vmem [resolvable:$true] %s899_s9 }
 0x125   : > { %s4203_s28 = scalar_lea.hbm %s4740_s14, 16  ;;  %p5687_p8 = scmp.ne.s32.totalorder %s5677_s16, 0 }
 0x126   : > { %p4204_p6 = scmp.ne.s32.totalorder %s4740_s14, %s4203_s28  ;;  %p4210_p10 = scmp.lt.u32.totalorder %s4203_s28, %s4740_s14 }
 0x128   : > { %p4206_p2 = pnand %p4204_p6, %p5687_p8 }
 0x12a   : > { %p4207_p5 = pneg %p4206_p2 }
 0x12c   : > { %p4212_p4 = pnand %p4210_p10, %p4207_p5 }
 0x12e   : > { %4215 = shalt.err (!%p4212_p4)
}
 0x12f   : > { %s4216_s23 = scalar_lea.vmem %s875_s7, 16  ;;  %s4223_s25 = scalar_lea.vmem %s875_s7, 32 }
 0x130   : > { %p4217_p7 = scmp.ne.s32.totalorder %s875_s7, %s4216_s23  ;;  %p4224_p1 = scmp.lt.s32.totalorder %s875_s7, %s875_s7 }
 0x131   : > { %p4225_p3 = scmp.lt.s32.totalorder %s4223_s25, %s4216_s23 }
 0x132   : > { %p4219_p9 = pnand %p4217_p7, %p5687_p8 }
 0x133   : > { %p4226_p0 = por %p4225_p3, %p4224_p1 }
 0x134   : > { %p4220_p12 = pneg %p4219_p9 }
 0x136   : > { %p4227_p11 = pnand %p4226_p0, %p4220_p12 }
 0x138   : > { %4230 = shalt.err (!%p4227_p11)
}
 0x139   : > { %p5688_p13 = scmp.ne.s32.totalorder %s5676_s26, 0  ;;  %s4231_s20 = scalar_lea.hbm %s4755_s30, 16 }
 0x13a   : > { %p4232_p6 = scmp.ne.s32.totalorder %s4755_s30, %s4231_s20  ;;  %p4238_p10 = scmp.lt.u32.totalorder %s4231_s20, %s4755_s30 }
 0x13b   : > { %3786 = dma.hbm_to_vmem [thread:$0]  (!%p5688_p13), %s4740_s14, 16, %s875_s7, [#allocation12]  }
 0x13c   : > { %p4234_p2 = pnand %p4232_p6, %p5687_p8 }
 0x13e   : > { %p4235_p5 = pneg %p4234_p2 }
 0x140   : > { %p4240_p4 = pnand %p4238_p10, %p4235_p5 }
 0x142   : > { %4243 = shalt.err (!%p4240_p4)
}
 0x143   : > { %s4244_s24 = scalar_lea.vmem %s5083_s9, 16  ;;  %s4251_s29 = scalar_lea.vmem %s5083_s9, 32 }
 0x144   : > { %p4245_p11 = scmp.ne.s32.totalorder %s5083_s9, %s4244_s24  ;;  %p4252_p12 = scmp.lt.s32.totalorder %s5083_s9, %s5083_s9 }
 0x145   : > { %p4253_p1 = scmp.lt.s32.totalorder %s4251_s29, %s4244_s24 }
 0x146   : > { %p4247_p7 = pnand %p4245_p11, %p5687_p8 }
 0x147   : > { %p4254_p3 = por %p4253_p1, %p4252_p12 }
 0x148   : > { %p4248_p9 = pneg %p4247_p7 }
 0x14a   : > { %p4255_p0 = pnand %p4254_p3, %p4248_p9 }
 0x14c   : > { %4258 = shalt.err (!%p4255_p0)
}
 0x14d   : > { %3792 = dma.hbm_to_vmem [thread:$0]  (!%p5688_p13), %s4755_s30, 16, %s5083_s9, [#allocation15]  }
 0x14e   : > { %s4669_s7 = smov [#allocation19]   ;;  %s4670_s28 = smov [#allocation22]  }
 0x14f   : > { %s920_s18 = sshll.u32 %s4669_s7, 4  ;;  %s944_s23 = sshll.u32 %s4670_s28, 4  ;;  %s921_s18 = int_to_ptr.vmem [resolvable:$true] %s920_s18  ;;  %s5111_s23 = int_to_ptr.vmem [resolvable:$true] %s944_s23 }
 0x150   : > { %s4259_s25 = scalar_lea.hbm %s5665_s12, 512 }
 0x151   : > { %p4260_p6 = scmp.ne.s32.totalorder %s5665_s12, %s4259_s25  ;;  %p4266_p10 = scmp.lt.u32.totalorder %s4259_s25, %s5665_s12 }
 0x153   : > { %p4262_p2 = pnand %p4260_p6, %p5687_p8 }
 0x155   : > { %p4263_p5 = pneg %p4262_p2 }
 0x157   : > { %p4268_p4 = pnand %p4266_p10, %p4263_p5 }
 0x159   : > { %4271 = shalt.err (!%p4268_p4)
}
 0x15a   : > { %s4272_s20 = scalar_lea.vmem %s921_s18, 512  ;;  %p4280_p12 = scmp.lt.s32.totalorder %s921_s18, %s921_s18 }
 0x15b   : > { %p4273_p11 = scmp.ne.s32.totalorder %s921_s18, %s4272_s20  ;;  %p4281_p1 = scmp.lt.s32.totalorder %s4272_s20, %s4272_s20 }
 0x15d   : > { %p4275_p7 = pnand %p4273_p11, %p5687_p8  ;;  %p4282_p3 = por %p4281_p1, %p4280_p12 }
 0x15f   : > { %p4276_p9 = pneg %p4275_p7 }
 0x161   : > { %p4283_p0 = pnand %p4282_p3, %p4276_p9 }
 0x163   : > { %4286 = shalt.err (!%p4283_p0)
}
 0x164   : > { %s5689_s9 = smov 8   ;;  %s5690_s24 = smov 128  }
 0x165   : > { %3798 = dma.hbm_to_vmem [thread:$0]  (!%p5688_p13), %s5665_s12, 512, %s921_s18, [#allocation18], %s5690_s24, %s5690_s24, %s5689_s9  }
 0x166   : > { %s4287_s29 = scalar_lea.hbm %s4775_s27, 512 }
 0x167   : > { %p4288_p6 = scmp.ne.s32.totalorder %s4775_s27, %s4287_s29  ;;  %p4294_p10 = scmp.lt.u32.totalorder %s4287_s29, %s4775_s27 }
 0x169   : > { %p4290_p2 = pnand %p4288_p6, %p5687_p8 }
 0x16b   : > { %p4291_p5 = pneg %p4290_p2 }
 0x16d   : > { %p4296_p4 = pnand %p4294_p10, %p4291_p5 }
 0x16f   : > { %4299 = shalt.err (!%p4296_p4)
}
 0x170   : > { %s4300_s7 = scalar_lea.vmem %s5111_s23, 512  ;;  %p4308_p12 = scmp.lt.s32.totalorder %s5111_s23, %s5111_s23 }
 0x171   : > { %p4301_p11 = scmp.ne.s32.totalorder %s5111_s23, %s4300_s7  ;;  %p4309_p1 = scmp.lt.s32.totalorder %s4300_s7, %s4300_s7 }
 0x173   : > { %p4303_p7 = pnand %p4301_p11, %p5687_p8  ;;  %p4310_p3 = por %p4309_p1, %p4308_p12 }
 0x175   : > { %p4304_p9 = pneg %p4303_p7 }
 0x177   : > { %p4311_p0 = pnand %p4310_p3, %p4304_p9 }
 0x179   : > { %4314 = shalt.err (!%p4311_p0)
}
 0x17a   : > { %3804 = dma.hbm_to_vmem [thread:$0]  (!%p5688_p13), %s4775_s27, 512, %s5111_s23, [#allocation21], %s5690_s24, %s5690_s24, %s5689_s9  }
 0x17b   : > { %s4671_s18 = smov [#allocation25]   ;;  %s4672_s25 = smov [#allocation28]  }
 0x17c   : > { %s968_s28 = sshll.u32 %s4671_s18, 4  ;;  %s1006_s20 = sshll.u32 %s4672_s25, 4  ;;  %s969_s28 = int_to_ptr.vmem [resolvable:$true] %s968_s28  ;;  %s5144_s20 = int_to_ptr.vmem [resolvable:$true] %s1006_s20 }
 0x17d   : > { %s4315_s29 = scalar_lea.hbm %s4785_s19, 512 }
 0x17e   : > { %p4316_p6 = scmp.ne.s32.totalorder %s4785_s19, %s4315_s29  ;;  %p4322_p10 = scmp.lt.u32.totalorder %s4315_s29, %s4785_s19 }
 0x180   : > { %p4318_p2 = pnand %p4316_p6, %p5687_p8 }
 0x182   : > { %p4319_p5 = pneg %p4318_p2 }
 0x184   : > { %p4324_p4 = pnand %p4322_p10, %p4319_p5 }
 0x186   : > { %4327 = shalt.err (!%p4324_p4)
}
 0x187   : > { %s4328_s7 = scalar_lea.vmem %s969_s28, 512  ;;  %p4336_p12 = scmp.lt.s32.totalorder %s969_s28, %s969_s28 }
 0x188   : > { %p4329_p11 = scmp.ne.s32.totalorder %s969_s28, %s4328_s7  ;;  %p4337_p1 = scmp.lt.s32.totalorder %s4328_s7, %s4328_s7 }
 0x18a   : > { %p4331_p7 = pnand %p4329_p11, %p5687_p8  ;;  %p4338_p3 = por %p4337_p1, %p4336_p12 }
 0x18c   : > { %p4332_p9 = pneg %p4331_p7 }
 0x18e   : > { %p4339_p0 = pnand %p4338_p3, %p4332_p9 }
 0x190   : > { %4342 = shalt.err (!%p4339_p0)
}
 0x191   : > { %3810 = dma.hbm_to_vmem [thread:$0]  (!%p5688_p13), %s4785_s19, 512, %s969_s28, [#allocation24], %s5690_s24, %s5690_s24, %s5689_s9  }
 0x192   : > { %s4343_s23 = scalar_lea.hbm %s5663_s13, 512 }
 0x193   : > { %p4344_p6 = scmp.ne.s32.totalorder %s5663_s13, %s4343_s23  ;;  %p4350_p10 = scmp.lt.u32.totalorder %s4343_s23, %s5663_s13 }
 0x195   : > { %p4346_p2 = pnand %p4344_p6, %p5687_p8 }
 0x197   : > { %p4347_p5 = pneg %p4346_p2 }
 0x199   : > { %p4352_p4 = pnand %p4350_p10, %p4347_p5 }
 0x19b   : > { %4355 = shalt.err (!%p4352_p4)
}
 0x19c   : > { %s4356_s18 = scalar_lea.vmem %s5144_s20, 512  ;;  %p4364_p12 = scmp.lt.s32.totalorder %s5144_s20, %s5144_s20 }
 0x19d   : > { %p4357_p11 = scmp.ne.s32.totalorder %s5144_s20, %s4356_s18  ;;  %p4365_p1 = scmp.lt.s32.totalorder %s4356_s18, %s4356_s18 }
 0x19f   : > { %p4359_p7 = pnand %p4357_p11, %p5687_p8  ;;  %p4366_p3 = por %p4365_p1, %p4364_p12 }
 0x1a1   : > { %p4360_p9 = pneg %p4359_p7 }
 0x1a3   : > { %p4367_p0 = pnand %p4366_p3, %p4360_p9 }
 0x1a5   : > { %4370 = shalt.err (!%p4367_p0)
}
 0x1a6   : > { %s5691_s28 = sld [smem:[#allocation45_spill]]  ;;  %s1039_s26 = scalar_lea.vmem [#allocation2], %s5038_s17 }
 0x1a7   : > { %3816 = dma.hbm_to_vmem [thread:$0]  (!%p5688_p13), %s5663_s13, 512, %s5144_s20, [#allocation27], %s5690_s24, %s5690_s24, %s5689_s9  }
 0x1a8   : > { %s1046_s29 = sshll.u32 %s1039_s26, 4  ;;  %s5693_s7 = sand.u32 1, %s4619_s1   ;;  %s1047_s29 = int_to_ptr.vmem [resolvable:$true] %s1046_s29 }
 0x1a9   : > { %s1036_s23 = scalar_lea.sflag [#allocation3], %s5693_s7  ;;  %p5694_p6 = scmp.ne.s32.totalorder %s5686_s3, 0 }
 0x1ac   : > { %s5692_s25 = smov %s5691_s28  ;;  %s5179_s16 = scalar_lea.hbm %s5691_s28, %s5041_s4 }
 0x1ad   : > { %s4371_s18 = scalar_lea.hbm %s5179_s16, 128  ;;  %s4376_s12 = scalar_lea.hbm %s5692_s25, 256 }
 0x1ae   : > { %p4372_p8 = scmp.ne.s32.totalorder %s5179_s16, %s4371_s18  ;;  %p4377_p10 = scmp.lt.u32.totalorder %s5179_s16, %s5692_s25 }
 0x1af   : > { %p4378_p4 = scmp.lt.u32.totalorder %s4376_s12, %s4371_s18  ;;  %p4380_p11 = scmp.lt.u32.totalorder %s4371_s18, %s5179_s16 }
 0x1b0   : > { %p4374_p2 = pnand %p4372_p8, %p5694_p6 }
 0x1b1   : > { %p4379_p13 = por %p4378_p4, %p4377_p10 }
 0x1b2   : > { %p4375_p5 = pneg %p4374_p2 }
 0x1b3   : > { %p4381_p7 = por %p4380_p11, %p4379_p13 }
 0x1b5   : > { %p4382_p9 = pnand %p4381_p7, %p4375_p5 }
 0x1b7   : > { %4385 = shalt.err (!%p4382_p9)
}
 0x1b8   : > { %s4386_s9 = scalar_lea.vmem %s1047_s29, 128  ;;  %s4673_s24 = smov [#allocation2]  }
 0x1b9   : > { %p4387_p12 = scmp.ne.s32.totalorder %s1047_s29, %s4386_s9  ;;  %s4391_s20 = sshll.u32 %s4673_s24, 4  ;;  %s4392_s20 = int_to_ptr.vmem [resolvable:$false] %s4391_s20 }
 0x1ba   : > { %s4393_s28 = scalar_lea.vmem %s4392_s20, 256  ;;  %p4394_p0 = scmp.lt.s32.totalorder %s1047_s29, %s4392_s20 }
 0x1bb   : > { %p4389_p1 = pnand %p4387_p12, %p5694_p6  ;;  %p4395_p8 = scmp.lt.s32.totalorder %s4393_s28, %s4386_s9 }
 0x1bd   : > { %p4390_p3 = pneg %p4389_p1  ;;  %p4396_p2 = por %p4395_p8, %p4394_p0 }
 0x1bf   : > { %p4397_p4 = pnand %p4396_p2, %p4390_p3 }
 0x1c1   : > { %4400 = shalt.err (!%p4397_p4)
}
 0x1c2   : > { %p5695_p10 = scmp.ne.s32.totalorder %s5685_s6, 0  ;;  %s5696_s12 = sld [smem:[#allocation47_spill]] }
 0x1c3   : > { %s1075_s7 = scalar_lea.vmem [#allocation7], %s5038_s17 }
 0x1c4   : > { %3820 = dma.hbm_to_vmem [thread:$0]  (!%p5695_p10), %s5179_s16, 128, %s1047_s29, %s1036_s23  }
 0x1c5   : > { %s1082_s18 = sshll.u32 %s1075_s7, 4  ;;  %s1083_s18 = int_to_ptr.vmem [resolvable:$true] %s1082_s18 }
 0x1c8   : > { %s5199_s26 = scalar_lea.hbm %s5696_s12, %s5041_s4  ;;  %s4406_s24 = scalar_lea.hbm %s5696_s12, 256 }
 0x1c9   : > { %s4401_s9 = scalar_lea.hbm %s5199_s26, 128  ;;  %p4407_p7 = scmp.lt.u32.totalorder %s5199_s26, %s5696_s12 }
 0x1ca   : > { %p4402_p5 = scmp.ne.s32.totalorder %s5199_s26, %s4401_s9  ;;  %p4408_p9 = scmp.lt.u32.totalorder %s4406_s24, %s4401_s9 }
 0x1cb   : > { %p4410_p1 = scmp.lt.u32.totalorder %s4401_s9, %s5199_s26 }
 0x1cc   : > { %p4404_p13 = pnand %p4402_p5, %p5694_p6  ;;  %p4409_p12 = por %p4408_p9, %p4407_p7 }
 0x1ce   : > { %p4405_p11 = pneg %p4404_p13  ;;  %p4411_p3 = por %p4410_p1, %p4409_p12 }
 0x1d0   : > { %p4412_p0 = pnand %p4411_p3, %p4405_p11 }
 0x1d2   : > { %4415 = shalt.err (!%p4412_p0)
}
 0x1d3   : > { %s4416_s16 = scalar_lea.vmem %s1083_s18, 128  ;;  %s4674_s29 = smov [#allocation7]  }
 0x1d4   : > { %p4417_p8 = scmp.ne.s32.totalorder %s1083_s18, %s4416_s16  ;;  %s4421_s23 = sshll.u32 %s4674_s29, 4  ;;  %s4422_s23 = int_to_ptr.vmem [resolvable:$false] %s4421_s23 }
 0x1d5   : > { %s4423_s20 = scalar_lea.vmem %s4422_s23, 256  ;;  %p4424_p5 = scmp.lt.s32.totalorder %s1083_s18, %s4422_s23 }
 0x1d6   : > { %p4419_p2 = pnand %p4417_p8, %p5694_p6  ;;  %p4425_p13 = scmp.lt.s32.totalorder %s4423_s20, %s4416_s16 }
 0x1d8   : > { %p4420_p4 = pneg %p4419_p2  ;;  %p4426_p10 = por %p4425_p13, %p4424_p5 }
 0x1da   : > { %p4427_p7 = pnand %p4426_p10, %p4420_p4 }
 0x1dc   : > { %4430 = shalt.err (!%p4427_p7)
}
 0x1dd   : > { %p5697_p9 = scmp.ne.s32.totalorder %s5685_s6, 0  ;;  %s5698_s28 = sld [smem:[#allocation48_spill]] }
 0x1de   : > { %s1093_s24 = scalar_lea.vmem [#allocation8], %s5038_s17  ;;  %s5700_s29 = sand.u32 1, %s4623_s2  }
 0x1df   : > { %3826 = dma.hbm_to_vmem [thread:$0]  (!%p5697_p9), %s5199_s26, 128, %s1083_s18, %s5057_s22  }
 0x1e0   : > { %s1100_s16 = sshll.u32 %s1093_s24, 4  ;;  %s1090_s23 = scalar_lea.sflag [#allocation9], %s5700_s29  ;;  %s1101_s16 = int_to_ptr.vmem [resolvable:$true] %s1100_s16 }
 0x1e3   : > { %s5699_s7 = smov %s5698_s28  ;;  %s5218_s9 = scalar_lea.hbm %s5698_s28, %s5041_s4 }
 0x1e4   : > { %s4431_s20 = scalar_lea.hbm %s5218_s9, 128  ;;  %s4436_s12 = scalar_lea.hbm %s5699_s7, 256 }
 0x1e5   : > { %p4432_p10 = scmp.ne.s32.totalorder %s5218_s9, %s4431_s20  ;;  %p4437_p1 = scmp.lt.u32.totalorder %s5218_s9, %s5699_s7 }
 0x1e6   : > { %p4438_p3 = scmp.lt.u32.totalorder %s4436_s12, %s4431_s20  ;;  %p4440_p8 = scmp.lt.u32.totalorder %s4431_s20, %s5218_s9 }
 0x1e7   : > { %p4434_p11 = pnand %p4432_p10, %p5694_p6 }
 0x1e8   : > { %p4439_p0 = por %p4438_p3, %p4437_p1 }
 0x1e9   : > { %p4435_p12 = pneg %p4434_p11 }
 0x1ea   : > { %p4441_p2 = por %p4440_p8, %p4439_p0 }
 0x1ec   : > { %p4442_p4 = pnand %p4441_p2, %p4435_p12 }
 0x1ee   : > { %4445 = shalt.err (!%p4442_p4)
}
 0x1ef   : > { %s4446_s4 = scalar_lea.vmem %s1101_s16, 128  ;;  %s4675_s22 = smov [#allocation8]  }
 0x1f0   : > { %p4447_p5 = scmp.ne.s32.totalorder %s1101_s16, %s4446_s4  ;;  %s4451_s17 = sshll.u32 %s4675_s22, 4  ;;  %s4452_s17 = int_to_ptr.vmem [resolvable:$false] %s4451_s17 }
 0x1f1   : > { %s4453_s26 = scalar_lea.vmem %s4452_s17, 256  ;;  %p4454_p10 = scmp.lt.s32.totalorder %s1101_s16, %s4452_s17 }
 0x1f2   : > { %p4449_p13 = pnand %p4447_p5, %p5694_p6  ;;  %p4455_p11 = scmp.lt.s32.totalorder %s4453_s26, %s4446_s4 }
 0x1f4   : > { %p4450_p7 = pneg %p4449_p13  ;;  %p4456_p9 = por %p4455_p11, %p4454_p10 }
 0x1f6   : > { %p4457_p1 = pnand %p4456_p9, %p4450_p7 }
 0x1f8   : > { %4460 = shalt.err (!%p4457_p1)
}
 0x1f9   : > { %p5701_p3 = scmp.ne.s32.totalorder %s5685_s6, 0  ;;  %p5702_p12 = scmp.ne.s32.totalorder %s5675_s15, 0 }
 0x1fa   : > { %s5239_s3 = sand.u32 (!%p5702_p12), 1, %s4615_s0   ;;  %p5703_p6 = scmp.ne.s32.totalorder (!%p5702_p12), %s5681_s10, 0 }
 0x1fb   : > { %3829 = dma.hbm_to_vmem [thread:$0]  (!%p5701_p3), %s5218_s9, 128, %s1101_s16, %s1090_s23  }
 0x1fc   : > { %1109 = sbr.rel (%p5702_p12) target bundleno = 4330 (0x10ea), region = 140  ;;  %s5242_s12 = sshll.u32 (!%p5702_p12), %s5239_s3, 3 }
 0x1fd   : > { %s1112_s18 = scalar_lea.sflag (!%p5702_p12), [#allocation3], %s5239_s3  ;;  %s1115_s28 = scalar_lea.vmem (!%p5702_p12), [#allocation2], %s5242_s12 }
 0x203   : > { %4562 = dma.done.wait (%p5703_p6), %s1112_s18, 128  }
 0x204   : > { %4564 = vsyncadd (%p5703_p6), %s1112_s18, 4294967168  ;;  %s5251_s6 = sand.u32 1, %s4878_s11   ;;  %s1124_s9 = scalar_lea.vmem [#allocation5], %s5242_s12 }
 0x205   : > { %s1121_s15 = scalar_lea.sflag [#allocation6], %s5251_s6 }
 0x206   : > { %4566 = dma.done.wait (%p5703_p6), %s1121_s15, 256  }
 0x207   : > { %4568 = vsyncadd (%p5703_p6), %s1121_s15, 4294967040  ;;  %s1133_s24 = scalar_lea.vmem [#allocation7], %s5242_s12  ;;  %s1139_s16 = scalar_lea.sflag [#allocation9], %s5251_s6 }
 0x208   : > { %s1142_s29 = scalar_lea.vmem [#allocation8], %s5242_s12 }
 0x209   : > { %4570 = dma.done.wait (%p5703_p6), %s1139_s16, 128  }
 0x20a   : > { %4572 = vsyncadd (%p5703_p6), %s1139_s16, 4294967168  ;;  %p5704_p9 = scmp.eq.s32.totalorder %s4878_s11, 0 }
 0x20c   : > { %4574 = dma.done.wait (%p5704_p9), [#allocation9], 16   ;;  %p5705_p0 = pmov %p5704_p9 }
 0x20e   : > { %4576 = vsyncadd (%p5705_p0), [#allocation9], 4294967280  ;;  %p5706_p8 = pmov %p5705_p0 }
 0x20f   : > { %p5707_p2 = pmov %p5705_p0 }
 0x210   : > { %4578 = dma.done.wait (%p5706_p8), [#allocation12], 32  }
 0x211   : > { %4580 = vsyncadd (%p5707_p2), [#allocation12], 4294967264  ;;  %p5708_p4 = pmov %p5705_p0 }
 0x212   : > { %p5709_p5 = pmov %p5705_p0 }
 0x213   : > { %4582 = dma.done.wait (%p5708_p4), [#allocation15], 32  }
 0x214   : > { %4584 = vsyncadd (%p5709_p5), [#allocation15], 4294967264  ;;  %p5710_p13 = pmov %p5705_p0 }
 0x215   : > { %p5711_p7 = pmov %p5705_p0 }
 0x216   : > { %4586 = dma.done.wait (%p5710_p13), [#allocation18], 528  }
 0x217   : > { %4588 = vsyncadd (%p5711_p7), [#allocation18], 4294966768  ;;  %p5712_p10 = pmov %p5705_p0 }
 0x218   : > { %p5713_p11 = pmov %p5705_p0 }
 0x219   : > { %4590 = dma.done.wait (%p5712_p10), [#allocation21], 528  }
 0x21a   : > { %4592 = vsyncadd (%p5713_p11), [#allocation21], 4294966768  ;;  %p5714_p1 = pmov %p5705_p0 }
 0x21b   : > { %p5715_p3 = pmov %p5705_p0 }
 0x21c   : > { %4594 = dma.done.wait (%p5714_p1), [#allocation24], 528  }
 0x21d   : > { %4596 = vsyncadd (%p5715_p3), [#allocation24], 4294966768  ;;  %p5716_p12 = pmov %p5705_p0 }
 0x21e   : > { %p5717_p6 = pmov %p5705_p0 }
 0x21f   : > { %4598 = dma.done.wait (%p5716_p12), [#allocation27], 1024  }
 0x220   : > { %4600 = vsyncadd (%p5717_p6), [#allocation27], 4294966272  ;;  %s5718_s10 = sld [smem:[#allocation49_spill]]  ;;  %s5719_s23 = sld [smem:[#allocation51_spill]]  ;;  %v4676_v0 = vmov 0.0|0.0   ;;  %vm4677_vm0 = vmmov 0  }
 0x221   : > { %3645 = vmatprep.subr.bf16.mxu1 %v4676_v0  ;;  %v4678_v1 = vmov 0.0   ;;  %3657 = vmatprep.subr.bf16.mxu0 %v4676_v0  ;;  %v5309_v10 = vld [vmem:[%s1115_s28] sm:$0xff]  ;;  %vm1336_vm1 = vcmask 261120   ;;  %s5720_s20 = sld [smem:[#allocation53_spill]]  ;;  %vm1572_vm2 = vcmask 130048   ;;  %s4679_s4 = smov 112  }
 0x222   : > { %3495 = vmatprep.mubr.msk.f32.mxu1 %vm4677_vm0, %v4678_v1  ;;  %3517 = vmatprep.mubr.msk.f32.mxu0 %vm4677_vm0, %v4678_v1  ;;  %v3373_v17 = vld [vmem:[#allocation11] ss:$0 sm:$0xff]  ;;  %v3371_v19 = vld [vmem:[#allocation10] ss:$0 sm:$0xff]  ;;  %v3375_v33 = vld [vmem:[#allocation13] ss:$0 sm:$0xff] }
 0x223   : > { %v1302_v37 = vld [vmem:[%s1133_s24] sm:$0xff]  ;;  %vm1725_vm4 = vcmask 64512   ;;  %s5721_s22 = sld [smem:[#allocation54_spill]]  ;;  %s3369_s17 = sshll.u32 %s5239_s3, 4  ;;  %vm2813_vm6 = vcmask 523264  }
 0x224   : > { %vm1303_vm3 = vcmp.gt.f32.partialorder %v1302_v37, 0.0  ;;  %s5359_s26 = scalar_lea.vmem [#allocation30], %s3369_s17  ;;  %s4680_s18 = smov 16  }
 0x225   : > { %v1304_v42 = vsel %vm1303_vm3, -1e+30, %v4678_v1  ;;  %s5722_s28 = sld [smem:[#allocation60_spill]]  ;;  %s5430_s15 = scalar_lea.vmem [#allocation32], %s3369_s17 }
 0x226   : > { %v1308_v2 = vld [vmem:[%s5718_s10] sm:$0xff]  ;;  %v1309_v3 = vld [vmem:[%s5718_s10 + $0x8] sm:$0xff]  ;;  %v1310_v4 = vld [vmem:[%s5718_s10 + $0x10] sm:$0xff]  ;;  %s5724_s24 = sld [smem:[#allocation67_spill]]  ;;  %s5725_s16 = sld [smem:[#allocation63_spill]] }
 0x227   : > { %v3646_v5 = vpack.c.bf16 %v1309_v3, %v1308_v2  ;;  %v1311_v6 = vld [vmem:[%s5718_s10 + $0x18] sm:$0xff]  ;;  %v1313_v8 = vld [vmem:[%s5719_s23] sm:$0xff]  ;;  %v1314_v9 = vld [vmem:[%s5719_s23 + $0x8] sm:$0xff]  ;;  %s5728_s17 = sld [smem:[#allocation68_spill]]  ;;  %p5729_p0 = scmp.ne.s32.totalorder %s5682_s21, 0 }
 0x228   : > { %v3649_v7 = vpack.c.bf16 %v1311_v6, %v1310_v4  ;;  %v3652_v11 = vpack.c.bf16 %v1314_v9, %v1313_v8  ;;  %v1315_v12 = vld [vmem:[%s5719_s23 + $0x10] sm:$0xff]  ;;  %v1316_v13 = vld [vmem:[%s5719_s23 + $0x18] sm:$0xff]  ;;  %v1318_v23 = vld [vmem:[%s5720_s20] sm:$0xff] }
 0x229   : > { %3647 = vmatpush3.bf16.msra.mxu1 %v3646_v5  ;;  %v3655_v14 = vpack.c.bf16 %v1316_v13, %v1315_v12  ;;  %v1319_v24 = vld [vmem:[%s5720_s20 + $0x8] sm:$0xff]  ;;  %v1320_v25 = vld [vmem:[%s5720_s20 + $0x10] sm:$0xff]  ;;  %v1321_v27 = vld [vmem:[%s5720_s20 + $0x18] sm:$0xff] }
 0x22a   : > { %3648 = vmatprep.subr.bf16.mxu1 %v4676_v0  ;;  %v3658_v26 = vpack.c.bf16 %v1319_v24, %v1318_v23  ;;  %v3661_v28 = vpack.c.bf16 %v1321_v27, %v1320_v25  ;;  %v1323_v2 = vld [vmem:[%s5721_s22] sm:$0xff]  ;;  %v1324_v3 = vld [vmem:[%s5721_s22 + $0x8] sm:$0xff]  ;;  %v1325_v4 = vld [vmem:[%s5721_s22 + $0x10] sm:$0xff] }
 0x22b   : > { %v3664_v5 = vpack.c.bf16 %v1324_v3, %v1323_v2  ;;  %v1326_v6 = vld [vmem:[%s5721_s22 + $0x18] sm:$0xff]  ;;  %v2016_v23 = vld [vmem:[#allocation22] sm:$0xff]  ;;  %v2019_v27 = vld [vmem:[#allocation22 + $0x18] sm:$0xff] }
 0x22c   : > { %3659 = vmatpush3.bf16.msra.mxu0 %v3658_v26  ;;  %v2017_v24 = vld [vmem:[#allocation22 + $0x8] sm:$0xff]  ;;  %v2018_v26 = vld [vmem:[#allocation22 + $0x10] sm:$0xff] }
 0x22d   : > { %3650 = vmatpush3.bf16.msra.mxu1 %v3649_v7  ;;  %3660 = vmatprep.subr.bf16.mxu0 %v4676_v0  ;;  %v3667_v7 = vpack.c.bf16 %v1326_v6, %v1325_v4  ;;  %v3676_v25 = vpack.c.bf16 %v2017_v24, %v2016_v23  ;;  %v3391_v2 = vld [vmem:[%s5722_s28] ss:$0 sm:$0xff] }
 0x22e   : > { %3651 = vmatprep.subr.bf16.mxu1 %v4676_v0 }
 0x230   : > { %3496 = vmatmul.mubr.msk.f32.vlgmr.msra.gmra.mrb[0].mxu1 %vm1336_vm1, %v5309_v10  ;;  %3662 = vmatpush3.bf16.msra.mxu0 %v3661_v28  ;;  %v3679_v28 = vpack.c.bf16 %v2019_v27, %v2018_v26 }
 0x231   : > { %3653 = vmatpush3.bf16.msra.mxu1 %v3652_v11  ;;  %3506 = vmatprep.mubr.msk.f32.mxu1 %vm4677_vm0, %v4678_v1 }
 0x232   : > { %3654 = vmatprep.subr.bf16.mxu1 %v4676_v0  ;;  %3530 = vmatprep.subr.mxu0 %v4678_v1 }
 0x233   : > { %3518 = vmatmul.mubr.msk.f32.vlgmr.msra.gmra.mrb[0].mxu0 %vm1336_vm1, %v5309_v10 }
 0x234   : > { %3532 = vmatprep.mubr.msk.f32.mxu0 %vm4677_vm0, %v4678_v1 }
 0x235   : > { %3656 = vmatpush3.bf16.msra.mxu1 %v3655_v14 }
 0x236   : > { %3520 = vmatprep.subr.mxu1 %v4678_v1 }
 0x238   : > { %3507 = vmatmul.mubr.msk.f32.vlgmr.msra.gmra.mrb[2].mxu1 %vm1336_vm1, %v5309_v10 }
 0x239   : > { %3522 = vmatprep.mubr.msk.f32.mxu1 %vm4677_vm0, %v4678_v1 }
 0x303   : > { %v1406_v15 = vpop.f32.mrb[0].mxu1 }
 0x304   : > { %v3497_v16 = vpop.f32.mrb[1].mxu1  ;;  %v1407_v22 = vadd.f32 %v3371_v19, %v1406_v15  ;;  %v3383_v15 = vld [vmem:[#allocation14] ss:$0 sm:$0xff] }
 0x306   : > { %v1558_v34 = vpop.f32.mrb[0].mxu0 }
 0x307   : > { %v1559_v35 = vadd.f32 %v3375_v33, %v1558_v34  ;;  %v3519_v36 = vpop.f32.mrb[1].mxu0  ;;  %v2014_v33 = vld [vmem:[#allocation19 + $0x18] sm:$0xff] }
 0x309   : > { %3531 = vmatpush3.msra.mxu0 %v1559_v35 }
 0x30a   : > { %3663 = vmatprep.subr.bf16.mxu0 %v4676_v0 }
 0x30b   : > { %v1482_v18 = vpop.f32.mrb[2].mxu1 }
 0x30c   : > { %v1483_v20 = vadd.f32 %v3373_v17, %v1482_v18  ;;  %v3508_v21 = vpop.f32.mrb[3].mxu1 }
 0x30e   : > { %1566 = vrot.lane.b32.xlu0 %v1483_v20, %s4679_s4  ;;  %3521 = vmatpush3.xpose.msk.msra.mxu1 %vm1572_vm2, %v1483_v20 }
 0x30f   : > { %3525 = vmatprep.subr.mxu1 %v4678_v1 }
 0x311   : > { %3523 = vmatmul.mubr.msk.f32.vlgmr.msra.gmra.mrb[4].mxu1 %vm1572_vm2, %v1407_v22 }
 0x312   : > { %1563 = vrot.lane.b32.xlu0 %v1407_v22, %s4679_s4  ;;  %3527 = vmatprep.mubr.msk.f32.mxu1 %vm4677_vm0, %v4678_v1 }
 0x380   : > { %v1567_v29 = vpop.permute.xlu0 %1566 }
 0x381   : > { %3526 = vmatpush3.xpose.msk.msra.mxu1 %vm1572_vm2, %v1567_v29  ;;  %v2011_v29 = vld [vmem:[#allocation19] sm:$0xff] }
 0x382   : > { %3535 = vmatprep.subr.mxu1 %v4678_v1 }
 0x384   : > { %v1564_v30 = vpop.permute.xlu0 %1563 }
 0x385   : > { %3528 = vmatmul.mubr.msk.f32.vlgmr.msra.gmra.mrb[6].mxu1 %vm1572_vm2, %v1564_v30  ;;  %v2012_v30 = vld [vmem:[#allocation19 + $0x8] sm:$0xff] }
 0x386   : > { %3537 = vmatprep.mubr.msk.f32.mxu1 %vm4677_vm0, %v4678_v1 }
 0x3e4   : > { %v1643_v31 = vpop.f32.mrb[4].mxu1 }
 0x3e5   : > { %v3524_v32 = vpop.f32.mrb[5].mxu1  ;;  %v1721_v39 = vmul.f32 0.25, %v1643_v31  ;;  %v1301_v31 = vld [vmem:[%s1124_s9] sm:$0xff]  ;;  %s5723_s9 = sld [smem:[#allocation62_spill]] }
 0x3e6   : > { %v2013_v32 = vld [vmem:[#allocation19 + $0x10] sm:$0xff] }
 0x3e7   : > { %v1723_v45 = vadd.f32 %v1721_v39, %v1304_v42  ;;  %v3673_v34 = vpack.c.bf16 %v2014_v33, %v2013_v32 }
 0x3e9   : > { %v1726_v46 = vsel %vm1725_vm4, %v1723_v45, -inf }
 0x458   : > { %v1717_v38 = vpop.f32.mrb[6].mxu1 }
 0x459   : > { %v1722_v40 = vmul.f32 0.25, %v1717_v38  ;;  %v3529_v41 = vpop.f32.mrb[7].mxu1 }
 0x45b   : > { %v1724_v43 = vadd.f32 %v1722_v40, %v1304_v42 }
 0x45d   : > { %v1729_v44 = vsel %vm1725_vm4, %v1724_v43, -inf }
 0x45e   : > { %1730 = vmax.xlane.f32.xlu1 %v1729_v44  ;;  %v3385_v44 = vld [vmem:[#allocation16] ss:$0 sm:$0xff] }
 0x462   : > { %1727 = vmax.xlane.f32.xlu1 %v1726_v46  ;;  %v3386_v46 = vld [vmem:[#allocation17] ss:$0 sm:$0xff] }
 0x473   : > { %1569 = vrot.lane.b32.xlu1 %v1559_v35, %s4679_s4 }
 0x4eb   : > { %v1731_v47 = vpop.xlane.xlu1 %1730 }
 0x4ec   : > { %v1733_v48 = vsub.f32 %v1724_v43, %v1731_v47 }
 0x4ee   : > { %v1736_v49 = vmul.f32 1.442695, %v1733_v48 }
 0x4ef   : > { %v1728_v50 = vpop.xlane.xlu1 %1727 }
 0x4f0   : > { %3955 = vpow2.f32 %v1736_v49  ;;  %v1732_v51 = vsub.f32 %v1723_v45, %v1728_v50  ;;  %v3389_v49 = vld [vmem:[#allocation23] ss:$0 sm:$0xff] }
 0x4f2   : > { %v1734_v52 = vmul.f32 1.442695, %v1732_v51 }
 0x4f3   : > { %v1570_v57 = vpop.permute.xlu1 %1569 }
 0x4f4   : > { %3957 = vpow2.f32 %v1734_v52  ;;  %3536 = vmatpush3.msra.mxu1 %v1570_v57  ;;  %v2024_v57 = vld [vmem:[#allocation25 + $0x18] sm:$0xff] }
 0x4f5   : > { %3669 = vmatprep.subr.bf16.mxu1 %v4676_v0 }
 0x4fa   : > { %v3956_v53 = vpop.eup %3955 }
 0x4fb   : > { %v1741_v54 = vsel %vm1725_vm4, %v3956_v53, 0.0 }
 0x4fc   : > { %1742 = vadd.xlane.f32.xlu0 %v1741_v54  ;;  %v2022_v54 = vld [vmem:[#allocation25 + $0x8] sm:$0xff] }
 0x4fe   : > { %v3958_v55 = vpop.eup %3957 }
 0x4ff   : > { %v1738_v56 = vsel %vm1725_vm4, %v3958_v55, 0.0 }
 0x500   : > { %1739 = vadd.xlane.f32.xlu1 %v1738_v56 }
 0x589   : > { %v1743_v58 = vpop.xlane.xlu0 %1742 }
 0x58a   : > { %3959 = vrcp.f32 %v1743_v58 }
 0x58d   : > { %v1740_v59 = vpop.xlane.xlu1 %1739 }
 0x58e   : > { %3961 = vrcp.f32 %v1740_v59 }
 0x594   : > { %v3960_v60 = vpop.eup %3959 }
 0x595   : > { %v1747_v61 = vmul.f32 %v3960_v60, %v3956_v53  ;;  %v2021_v53 = vld [vmem:[#allocation25] sm:$0xff]  ;;  %v3387_v60 = vld [vmem:[#allocation20] ss:$0 sm:$0xff] }
 0x596   : > { %v3682_v56 = vpack.c.bf16 %v2022_v54, %v2021_v53 }
 0x597   : > { %2010 = vst.msk [vmem:[%s5359_s26 + $0x8] sm:$0xff] %vm1725_vm4, %v1747_v61  ;;  %3538 = vmatmul.mubr.msk.f32.vlgmr.msra.gmra.mrb[8].mxu1 %vm1725_vm4, %v1747_v61 }
 0x598   : > { %v3962_v62 = vpop.eup %3961  ;;  %3559 = vmatprep.mubr.msk.f32.mxu1 %vm4677_vm0, %v4678_v1 }
 0x599   : > { %v1746_v63 = vmul.f32 %v3962_v62, %v3958_v55  ;;  %v2023_v55 = vld [vmem:[#allocation25 + $0x10] sm:$0xff] }
 0x59a   : > { %v3685_v58 = vpack.c.bf16 %v2024_v57, %v2023_v55  ;;  %v2713_v57 = vld [vmem:[#allocation28] sm:$0xff] }
 0x59b   : > { %2009 = vst.msk [vmem:[%s5359_s26] sm:$0xff] %vm1725_vm4, %v1746_v63  ;;  %3533 = vmatmul.mubr.msk.f32.vlgmr.msra.gmra.mrb[2].mxu0 %vm1725_vm4, %v1746_v63 }
 0x59c   : > { %3548 = vmatprep.mubr.msk.f32.mxu0 %vm4677_vm0, %v4678_v1  ;;  %3665 = vmatpush3.bf16.msra.mxu0 %v3664_v5 }
 0x59d   : > { %3666 = vmatprep.subr.bf16.mxu0 %v4676_v0 }
 0x5a0   : > { %3668 = vmatpush3.bf16.msra.mxu0 %v3667_v7  ;;  %v1305_v7 = vld [vmem:[%s1142_s29] sm:$0xff]  ;;  %s5726_s29 = sld [smem:[#allocation64_spill]] }
 0x5a1   : > { %3675 = vmatprep.subr.bf16.mxu0 %v4676_v0  ;;  %vm1306_vm5 = vcmp.gt.f32.partialorder %v1305_v7, 0.0 }
 0x66a   : > { %v1890_v8 = vpop.f32.mrb[8].mxu1 }
 0x66b   : > { %1895 = vrot.lane.b32.xlu0 %v1890_v8, %s4680_s18  ;;  %v3539_v9 = vpop.f32.mrb[9].mxu1 }
 0x66c   : > { %v1307_v9 = vsel %vm1306_vm5, -1e+30, %v4678_v1 }
 0x66e   : > { %v1817_v11 = vpop.f32.mrb[2].mxu0 }
 0x66f   : > { %v3534_v12 = vpop.f32.mrb[3].mxu0 }
 0x6dd   : > { %v1896_v13 = vpop.permute.xlu0 %1895 }
 0x6de   : > { %v1898_v14 = vsel %vm1572_vm2, %v1817_v11, %v1896_v13 }
 0x6df   : > { %3549 = vmatmul.mubr.msk.f32.vlgmr.msra.gmra.mrb[4].mxu0 %vm1336_vm1, %v1898_v14 }
 0x6e0   : > { %3570 = vmatprep.mubr.msk.f32.mxu0 %vm4677_vm0, %v4678_v1  ;;  %3677 = vmatpush3.bf16.msra.mxu0 %v3676_v25 }
 0x6e1   : > { %3678 = vmatprep.subr.bf16.mxu0 %v4676_v0 }
 0x6e4   : > { %3680 = vmatpush3.bf16.msra.mxu0 %v3679_v28 }
 0x6e5   : > { %3584 = vmatprep.subr.mxu0 %v4678_v1 }
 0x6e7   : > { %3571 = vmatmul.mubr.msk.f32.vlgmr.msra.gmra.mrb[6].mxu0 %vm1336_vm1, %v1301_v31 }
 0x6e8   : > { %3586 = vmatprep.mubr.msk.f32.mxu0 %vm4677_vm0, %v4678_v1 }
 0x7b2   : > { %v1974_v16 = vpop.f32.mrb[4].mxu0 }
 0x7b3   : > { %v1975_v17 = vadd.f32 %v3383_v15, %v1974_v16  ;;  %v3550_v18 = vpop.f32.mrb[5].mxu0 }
 0x7b5   : > { %v1978_v19 = vadd.f32 %v1975_v17, %v5309_v10  ;;  %v3670_v10 = vpack.c.bf16 %v2012_v30, %v2011_v29 }
 0x7b7   : > { %v1979_v20 = vsel %vm1336_vm1, %v1978_v19, 0.0  ;;  %v1984_v21 = vmul.f32 %v1978_v19, %v1978_v19  ;;  %3671 = vmatpush3.bf16.msra.mxu1 %v3670_v10 }
 0x7b8   : > { %1980 = vadd.xlane.f32.xlu0 %v1979_v20  ;;  %3672 = vmatprep.subr.bf16.mxu1 %v4676_v0 }
 0x7b9   : > { %v1985_v22 = vsel %vm1336_vm1, %v1984_v21, 0.0 }
 0x7ba   : > { %1986 = vadd.xlane.f32.xlu1 %v1985_v22  ;;  %v2187_v50 = vpop.f32.mrb[6].mxu0 }
 0x7bb   : > { %3674 = vmatpush3.bf16.msra.mxu1 %v3673_v34  ;;  %v2188_v51 = vadd.f32 %v3389_v49, %v2187_v50  ;;  %v3572_v52 = vpop.f32.mrb[7].mxu0  ;;  %v3399_v49 = vld [vmem:[%s5723_s9] ss:$0 sm:$0xff]  ;;  %s2956_s9 = sshll.u32 %s5359_s26, 4  ;;  %s5485_s9 = int_to_ptr.vmem [resolvable:$true] %s2956_s9 }
 0x7bc   : > { %3681 = vmatprep.subr.bf16.mxu1 %v4676_v0 }
 0x7bd   : > { %3585 = vmatpush3.xpose.msk.msra.mxu0 %vm1572_vm2, %v2188_v51 }
 0x7be   : > { %3594 = vmatprep.subr.mxu0 %v4678_v1 }
 0x7cb   : > { %2271 = vrot.lane.b32.xlu1 %v2188_v51, %s4679_s4 }
 0x845   : > { %v1981_v35 = vpop.xlane.xlu0 %1980 }
 0x846   : > { %v1983_v36 = vmul.f32 0.03125, %v1981_v35 }
 0x847   : > { %v1987_v37 = vpop.xlane.xlu1 %1986 }
 0x848   : > { %v1989_v38 = vmul.f32 %v1983_v36, %v1983_v36  ;;  %v1988_v39 = vmul.f32 0.03125, %v1987_v37  ;;  %v1991_v42 = vsub.f32 %v1978_v19, %v1983_v36  ;;  %v2026_v36 = vld [vmem:[#allocation26] sm:$0xff]  ;;  %v2027_v37 = vld [vmem:[#allocation26 + $0x8] sm:$0xff] }
 0x84a   : > { %v1990_v40 = vsub.f32 %v1988_v39, %v1989_v38  ;;  %v2028_v38 = vld [vmem:[#allocation26 + $0x10] sm:$0xff]  ;;  %v3688_v39 = vpack.c.bf16 %v2027_v37, %v2026_v36 }
 0x84b   : > { %v2272_v59 = vpop.permute.xlu1 %2271 }
 0x84c   : > { %v1992_v41 = vadd.f32 1e-05, %v1990_v40  ;;  %v2029_v40 = vld [vmem:[#allocation26 + $0x18] sm:$0xff] }
 0x84e   : > { %3963 = vrsqrt.f32 %v1992_v41  ;;  %v3691_v41 = vpack.c.bf16 %v2029_v40, %v2028_v38 }
 0x858   : > { %v3964_v43 = vpop.eup %3963 }
 0x859   : > { %v1994_v45 = vmul.f32 %v3964_v43, %v1991_v42 }
 0x85b   : > { %v2001_v47 = vmul.f32 %v3385_v44, %v1994_v45 }
 0x85d   : > { %v5394_v48 = vadd.f32 %v3386_v46, %v2001_v47 }
 0x85f   : > { %3560 = vmatmul.mubr.msk.f32.vlgmr.msra.gmra.mrb[10].mxu1 %vm1336_vm1, %v5394_v48 }
 0x860   : > { %3581 = vmatprep.mubr.msk.f32.mxu1 %vm4677_vm0, %v4678_v1  ;;  %3683 = vmatpush3.bf16.msra.mxu1 %v3682_v56 }
 0x861   : > { %3684 = vmatprep.subr.bf16.mxu1 %v4676_v0 }
 0x864   : > { %3686 = vmatpush3.bf16.msra.mxu1 %v3685_v58  ;;  %v2714_v58 = vld [vmem:[#allocation28 + $0x8] sm:$0xff] }
 0x865   : > { %3589 = vmatprep.subr.mxu1 %v4678_v1 }
 0x867   : > { %3582 = vmatmul.mubr.msk.f32.vlgmr.msra.gmra.mrb[12].mxu1 %vm1336_vm1, %v1301_v31 }
 0x868   : > { %3591 = vmatprep.mubr.msk.f32.mxu1 %vm4677_vm0, %v4678_v1 }
 0x86d   : > { %3590 = vmatpush3.xpose.msk.msra.mxu1 %vm1572_vm2, %v2272_v59  ;;  %v2715_v59 = vld [vmem:[#allocation28 + $0x10] sm:$0xff] }
 0x86e   : > { %3599 = vmatprep.subr.mxu1 %v4678_v1 }
 0x932   : > { %v2108_v61 = vpop.f32.mrb[10].mxu1 }
 0x933   : > { %v2109_v62 = vadd.f32 %v3387_v60, %v2108_v61  ;;  %v3561_v63 = vpop.f32.mrb[11].mxu1  ;;  %v2798_v61 = vld [vmem:[%s5724_s24] sm:$0xff] }
 0x934   : > { %v2800_v63 = vld [vmem:[%s5724_s24 + $0x10] sm:$0xff] }
 0x935   : > { %2268 = vrot.lane.b32.xlu1 %v2109_v62, %s4679_s4  ;;  %3587 = vmatmul.mubr.msk.f32.vlgmr.msra.gmra.mrb[8].mxu0 %vm1572_vm2, %v2109_v62  ;;  %v2799_v62 = vld [vmem:[%s5724_s24 + $0x8] sm:$0xff] }
 0x936   : > { %3596 = vmatprep.mubr.msk.f32.mxu0 %vm4677_vm0, %v4678_v1 }
 0x93a   : > { %v2263_v3 = vpop.f32.mrb[12].mxu1 }
 0x93b   : > { %v2264_v4 = vadd.f32 %v3391_v2, %v2263_v3  ;;  %v3583_v5 = vpop.f32.mrb[13].mxu1  ;;  %v3700_v2 = vpack.c.bf16 %v2799_v62, %v2798_v61  ;;  %v2801_v3 = vld [vmem:[%s5724_s24 + $0x18] sm:$0xff] }
 0x93c   : > { %v2802_v5 = vld [vmem:[%s5724_s24 + $0x20] sm:$0xff] }
 0x93d   : > { %3595 = vmatpush3.msra.mxu0 %v2264_v4 }
 0x93e   : > { %3687 = vmatprep.subr.bf16.mxu0 %v4676_v0 }
 0x9a7   : > { %v2269_v6 = vpop.permute.xlu1 %2268 }
 0x9a8   : > { %3592 = vmatmul.mubr.msk.f32.vlgmr.msra.gmra.mrb[14].mxu1 %vm1572_vm2, %v2269_v6  ;;  %v2803_v6 = vld [vmem:[%s5724_s24 + $0x28] sm:$0xff] }
 0x9a9   : > { %3601 = vmatprep.mubr.msk.f32.mxu1 %vm4677_vm0, %v4678_v1  ;;  %v3706_v7 = vpack.c.bf16 %v2803_v6, %v2802_v5 }
 0xa08   : > { %v2347_v8 = vpop.f32.mrb[8].mxu0 }
 0xa09   : > { %v2425_v11 = vmul.f32 0.25, %v2347_v8  ;;  %v3588_v12 = vpop.f32.mrb[9].mxu0 }
 0xa0b   : > { %v2427_v13 = vadd.f32 %v2425_v11, %v1307_v9 }
 0xa0d   : > { %v2429_v14 = vsel %vm1725_vm4, %v2427_v13, -inf }
 0xa0e   : > { %2430 = vmax.xlane.f32.xlu0 %v2429_v14 }
 0xa7b   : > { %v2421_v15 = vpop.f32.mrb[14].mxu1 }
 0xa7c   : > { %v2426_v16 = vmul.f32 0.25, %v2421_v15  ;;  %v3593_v17 = vpop.f32.mrb[15].mxu1 }
 0xa7e   : > { %v2428_v18 = vadd.f32 %v2426_v16, %v1307_v9 }
 0xa80   : > { %v2432_v19 = vsel %vm1725_vm4, %v2428_v18, -inf }
 0xa81   : > { %2433 = vmax.xlane.f32.xlu1 %v2432_v19 }
 0xa9b   : > { %v2431_v25 = vpop.xlane.xlu0 %2430 }
 0xa9c   : > { %v2435_v26 = vsub.f32 %v2427_v13, %v2431_v25 }
 0xa9e   : > { %v2437_v27 = vmul.f32 1.442695, %v2435_v26 }
 0xb0e   : > { %v2434_v20 = vpop.xlane.xlu1 %2433 }
 0xb0f   : > { %v2436_v21 = vsub.f32 %v2428_v18, %v2434_v20  ;;  %v3401_v18 = vld [vmem:[%s5725_s16] ss:$0 sm:$0xff]  ;;  %s2926_s16 = scalar_lea.sflag [#allocation31], %s5251_s6 }
 0xb10   : > { %v3402_v20 = vld [vmem:[%s5726_s29] ss:$0 sm:$0xff]  ;;  %s4461_s29 = scalar_lea.vmem %s5485_s9, 256 }
 0xb11   : > { %v2439_v22 = vmul.f32 1.442695, %v2436_v21  ;;  %p4462_p9 = scmp.ne.s32.totalorder %s5485_s9, %s4461_s29 }
 0xb13   : > { %3965 = vpow2.f32 %v2439_v22  ;;  %p4463_p8 = pnand %p4462_p9, %p5729_p0 }
 0xb14   : > { %3967 = vpow2.f32 %v2437_v27 }
 0xb15   : > { %p4464_p2 = pneg %p4463_p8 }
 0xb1d   : > { %v3966_v23 = vpop.eup %3965 }
 0xb1e   : > { %v2444_v24 = vsel %vm1725_vm4, %v3966_v23, 0.0  ;;  %v3968_v28 = vpop.eup %3967 }
 0xb1f   : > { %2445 = vadd.xlane.f32.xlu0 %v2444_v24  ;;  %v2441_v29 = vsel %vm1725_vm4, %v3968_v28, 0.0 }
 0xb35   : > { %2274 = vrot.lane.b32.xlu0 %v2264_v4, %s4679_s4  ;;  %v3703_v4 = vpack.c.bf16 %v2801_v3, %v2800_v63  ;;  %s5727_s4 = sld [smem:[#allocation66_spill]] }
 0xb3b   : > { %v3403_v25 = vld [vmem:[%s5727_s4] ss:$0 sm:$0xff]  ;;  %s4681_s4 = smov [#allocation30]  }
 0xb54   : > { %2442 = vadd.xlane.f32.xlu0 %v2441_v29 }
 0xbac   : > { %v2446_v30 = vpop.xlane.xlu0 %2445 }
 0xbad   : > { %3969 = vrcp.f32 %v2446_v30  ;;  %v3405_v30 = vld [vmem:[%s5728_s17] ss:$0 sm:$0xff]  ;;  %s4465_s17 = sshll.u32 %s4681_s4, 4  ;;  %s4466_s17 = int_to_ptr.vmem [resolvable:$false] %s4465_s17 }
 0xbae   : > { %p4468_p4 = scmp.lt.s32.totalorder %s5485_s9, %s4466_s17 }
 0xbb0   : > { %v2275_v10 = vpop.permute.xlu0 %2274 }
 0xbb1   : > { %3600 = vmatpush3.msra.mxu1 %v2275_v10 }
 0xbb2   : > { %3693 = vmatprep.subr.bf16.mxu1 %v4676_v0 }
 0xbb7   : > { %v3970_v31 = vpop.eup %3969 }
 0xbb8   : > { %v2450_v32 = vmul.f32 %v3970_v31, %v3966_v23  ;;  %v2805_v23 = vld [vmem:[%s5724_s24 + $0x38] sm:$0xff] }
 0xbba   : > { %2712 = vst.msk [vmem:[%s5430_s15 + $0x8] sm:$0xff] %vm1725_vm4, %v2450_v32  ;;  %3602 = vmatmul.mubr.msk.f32.vlgmr.msra.gmra.mrb[16].mxu1 %vm1725_vm4, %v2450_v32 }
 0xbbb   : > { %3623 = vmatprep.mubr.msk.f32.mxu1 %vm4677_vm0, %v4678_v1 }
 0xbe1   : > { %v2443_v33 = vpop.xlane.xlu0 %2442 }
 0xbe2   : > { %3971 = vrcp.f32 %v2443_v33 }
 0xbec   : > { %v3972_v34 = vpop.eup %3971 }
 0xbed   : > { %v2449_v35 = vmul.f32 %v3972_v34, %v3968_v28 }
 0xbef   : > { %2711 = vst.msk [vmem:[%s5430_s15] sm:$0xff] %vm1725_vm4, %v2449_v35  ;;  %3597 = vmatmul.mubr.msk.f32.vlgmr.msra.gmra.mrb[10].mxu0 %vm1725_vm4, %v2449_v35 }
 0xbf0   : > { %3612 = vmatprep.mubr.msk.f32.mxu0 %vm4677_vm0, %v4678_v1  ;;  %3689 = vmatpush3.bf16.msra.mxu0 %v3688_v39 }
 0xbf1   : > { %3690 = vmatprep.subr.bf16.mxu0 %v4676_v0 }
 0xbf4   : > { %3692 = vmatpush3.bf16.msra.mxu0 %v3691_v41 }
 0xbf5   : > { %3699 = vmatprep.subr.bf16.mxu0 %v4676_v0 }
 0xc8d   : > { %v2593_v42 = vpop.f32.mrb[16].mxu1 }
 0xc8e   : > { %2598 = vrot.lane.b32.xlu1 %v2593_v42, %s4680_s18  ;;  %v3603_v43 = vpop.f32.mrb[17].mxu1  ;;  %s5478_s18 = sshll.u32 %s4878_s11, 7  ;;  %s4467_s11 = scalar_lea.vmem %s4466_s17, 512 }
 0xc8f   : > { %s5482_s28 = scalar_lea.hbm %s5664_s8, %s5478_s18  ;;  %p4469_p5 = scmp.lt.s32.totalorder %s4467_s11, %s4461_s29 }
 0xc91   : > { %p4470_p13 = por %p4469_p5, %p4468_p4 }
 0xc93   : > { %p4471_p7 = pnand %p4470_p13, %p4464_p2 }
 0xcc2   : > { %v2520_v44 = vpop.f32.mrb[10].mxu0 }
 0xcc3   : > { %v3598_v45 = vpop.f32.mrb[11].mxu0 }
 0xd00   : > { %v2599_v46 = vpop.permute.xlu1 %2598 }
 0xd01   : > { %v2601_v47 = vsel %vm1572_vm2, %v2520_v44, %v2599_v46 }
 0xd02   : > { %3613 = vmatmul.mubr.msk.f32.vlgmr.msra.gmra.mrb[12].mxu0 %vm1336_vm1, %v2601_v47 }
 0xd03   : > { %3642 = vmatprep.mubr.msk.f32.mxu0 %vm4677_vm0, %v4678_v1  ;;  %v3694_v1 = vpack.c.bf16 %v2714_v58, %v2713_v57  ;;  %3701 = vmatpush3.bf16.msra.mxu0 %v3700_v2 }
 0xd04   : > { %3702 = vmatprep.subr.bf16.mxu0 %v4676_v0 }
 0xd05   : > { %3695 = vmatpush3.bf16.msra.mxu1 %v3694_v1 }
 0xd06   : > { %3696 = vmatprep.subr.bf16.mxu1 %v4676_v0 }
 0xd07   : > { %3704 = vmatpush3.bf16.msra.mxu0 %v3703_v4 }
 0xd08   : > { %3705 = vmatprep.subr.bf16.mxu0 %v4676_v0 }
 0xd0b   : > { %3707 = vmatpush3.bf16.msra.mxu0 %v3706_v7 }
 0xd0c   : > { %3708 = vmatprep.subr.bf16.mxu0 %v4676_v0  ;;  %v2804_v0 = vld [vmem:[%s5724_s24 + $0x30] sm:$0xff] }
 0xd0d   : > { %v3709_v24 = vpack.c.bf16 %v2805_v23, %v2804_v0 }
 0xd0f   : > { %3710 = vmatpush3.bf16.msra.mxu0 %v3709_v24 }
 0xdd5   : > { %v2677_v50 = vpop.f32.mrb[12].mxu0 }
 0xdd6   : > { %v2678_v51 = vadd.f32 %v3399_v49, %v2677_v50  ;;  %v3614_v52 = vpop.f32.mrb[13].mxu0 }
 0xdd8   : > { %v2681_v53 = vadd.f32 %v2678_v51, %v5394_v48  ;;  %v2716_v48 = vld [vmem:[#allocation28 + $0x18] sm:$0xff] }
 0xdd9   : > { %v3697_v60 = vpack.c.bf16 %v2716_v48, %v2715_v59 }
 0xdda   : > { %v2682_v54 = vsel %vm1336_vm1, %v2681_v53, 0.0  ;;  %v2686_v55 = vmul.f32 %v2681_v53, %v2681_v53 }
 0xddb   : > { %2683 = vadd.xlane.f32.xlu1 %v2682_v54  ;;  %3698 = vmatpush3.bf16.msra.mxu1 %v3697_v60 }
 0xddc   : > { %v2687_v56 = vsel %vm1336_vm1, %v2686_v55, 0.0 }
 0xddd   : > { %2688 = vadd.xlane.f32.xlu0 %v2687_v56 }
 0xe68   : > { %v2684_v8 = vpop.xlane.xlu1 %2683 }
 0xe69   : > { %v2685_v9 = vmul.f32 0.03125, %v2684_v8 }
 0xe6a   : > { %v2689_v11 = vpop.xlane.xlu0 %2688 }
 0xe6b   : > { %v2691_v12 = vmul.f32 %v2685_v9, %v2685_v9  ;;  %v2690_v13 = vmul.f32 0.03125, %v2689_v11  ;;  %v2693_v16 = vsub.f32 %v2681_v53, %v2685_v9 }
 0xe6d   : > { %v2692_v14 = vsub.f32 %v2690_v13, %v2691_v12 }
 0xe6f   : > { %v2694_v15 = vadd.f32 1e-05, %v2692_v14 }
 0xe71   : > { %3973 = vrsqrt.f32 %v2694_v15 }
 0xe7b   : > { %v3974_v17 = vpop.eup %3973 }
 0xe7c   : > { %v2696_v19 = vmul.f32 %v3974_v17, %v2693_v16 }
 0xe7e   : > { %v2703_v21 = vmul.f32 %v3401_v18, %v2696_v19 }
 0xe80   : > { %v2710_v22 = vadd.f32 %v3402_v20, %v2703_v21 }
 0xe82   : > { %3624 = vmatmul.mubr.msk.f32.vlgmr.msra.gmra.mrb[18].mxu1 %vm1336_vm1, %v2710_v22 }
 0xf55   : > { %v2793_v26 = vpop.f32.mrb[18].mxu1 }
 0xf56   : > { %v2794_v27 = vadd.f32 %v3403_v25, %v2793_v26  ;;  %v3625_v28 = vpop.f32.mrb[19].mxu1 }
 0xf58   : > { %v2797_v29 = vmax.f32 %v2794_v27, 0.0 }
 0xf5a   : > { %3643 = vmatmul.mubr.msk.f32.vlgmr.msra.gmra.mrb[14].mxu0 %vm2813_vm6, %v2797_v29 }
0x102d   : > { %v2883_v10 = vpop.f32.mrb[14].mxu0 }
0x102e   : > { %v2884_v31 = vadd.f32 %v3405_v30, %v2883_v10  ;;  %v3644_v32 = vpop.f32.mrb[15].mxu0 }
0x1030   : > { %v5470_v33 = vadd.f32 %v2884_v31, %v2710_v22 }
0x1032   : > { %v2890_v34 = vsel %vm1336_vm1, %v5470_v33, 0.0  ;;  %v2894_v35 = vmul.f32 %v5470_v33, %v5470_v33 }
0x1033   : > { %2891 = vadd.xlane.f32.xlu0 %v2890_v34 }
0x1034   : > { %v2895_v36 = vsel %vm1336_vm1, %v2894_v35, 0.0 }
0x1037   : > { %2896 = vadd.xlane.f32.xlu0 %v2895_v36 }
0x1038   : > { %4474 = shalt.err (!%p4471_p7)
}
0x1039   : > { %s4475_s26 = scalar_lea.hbm %s5482_s28, 256  ;;  %s4479_s4 = scalar_lea.hbm %s5664_s8, 512 }
0x103a   : > { %p4476_p10 = scmp.ne.s32.totalorder %s5482_s28, %s4475_s26  ;;  %p4480_p3 = scmp.lt.u32.totalorder %s5482_s28, %s5664_s8 }
0x103b   : > { %p4481_p12 = scmp.lt.u32.totalorder %s4479_s4, %s4475_s26  ;;  %p4483_p9 = scmp.lt.u32.totalorder %s4475_s26, %s5482_s28 }
0x103c   : > { %p4477_p11 = pnand %p4476_p10, %p5729_p0 }
0x103d   : > { %p4482_p6 = por %p4481_p12, %p4480_p3 }
0x103e   : > { %p4478_p1 = pneg %p4477_p11 }
0x103f   : > { %p4484_p8 = por %p4483_p9, %p4482_p6 }
0x1041   : > { %p4485_p2 = pnand %p4484_p8, %p4478_p1 }
0x1043   : > { %4488 = shalt.err (!%p4485_p2)
}
0x1044   : > { %s4682_s29 = smov 128   ;;  %s4683_s17 = smov 256  }
0x1045   : > { %s4684_s11 = smov 8   ;;  %s5512_s26 = scalar_lea.hbm %s4855_s5, %s5478_s18 }
0x1046   : > { %3772 = dma.vmem_to_hbm [thread:$0]  (%p5729_p0), %s5485_s9, 256, %s5482_s28, %s2926_s16, %s4682_s29, %s4683_s17, %s4684_s11  }
0x1047   : > { %s2971_s4 = sshll.u32 %s5430_s15, 4  ;;  %s4685_s8 = smov [#allocation32]   ;;  %s5515_s4 = int_to_ptr.vmem [resolvable:$true] %s2971_s4 }
0x1048   : > { %s4489_s7 = scalar_lea.vmem %s5515_s4, 256  ;;  %s4493_s10 = sshll.u32 %s4685_s8, 4  ;;  %s4494_s10 = int_to_ptr.vmem [resolvable:$false] %s4493_s10 }
0x1049   : > { %p4490_p4 = scmp.ne.s32.totalorder %s5515_s4, %s4489_s7  ;;  %s4495_s13 = scalar_lea.vmem %s4494_s10, 512 }
0x104a   : > { %p4496_p7 = scmp.lt.s32.totalorder %s5515_s4, %s4494_s10  ;;  %p4497_p10 = scmp.lt.s32.totalorder %s4495_s13, %s4489_s7 }
0x104b   : > { %p4491_p5 = pnand %p4490_p4, %p5729_p0 }
0x104c   : > { %p4498_p11 = por %p4497_p10, %p4496_p7 }
0x104d   : > { %p4492_p13 = pneg %p4491_p5 }
0x104f   : > { %p4499_p1 = pnand %p4498_p11, %p4492_p13 }
0x1051   : > { %4502 = shalt.err (!%p4499_p1)
}
0x1052   : > { %s4503_s15 = scalar_lea.hbm %s5512_s26, 256  ;;  %s4507_s8 = scalar_lea.hbm %s4855_s5, 512 }
0x1053   : > { %p4504_p3 = scmp.ne.s32.totalorder %s5512_s26, %s4503_s15  ;;  %p4508_p9 = scmp.lt.u32.totalorder %s5512_s26, %s4855_s5 }
0x1054   : > { %p4509_p8 = scmp.lt.u32.totalorder %s4507_s8, %s4503_s15  ;;  %p4511_p4 = scmp.lt.u32.totalorder %s4503_s15, %s5512_s26 }
0x1055   : > { %p4505_p12 = pnand %p4504_p3, %p5729_p0 }
0x1056   : > { %p4510_p2 = por %p4509_p8, %p4508_p9 }
0x1057   : > { %p4506_p6 = pneg %p4505_p12 }
0x1058   : > { %p4512_p5 = por %p4511_p4, %p4510_p2 }
0x105a   : > { %p4513_p13 = pnand %p4512_p5, %p4506_p6 }
0x105c   : > { %4516 = shalt.err (!%p4513_p13)
}
0x105d   : > { %s5730_s13 = sld [smem:[#allocation69_spill]]  ;;  %s5731_s7 = sld [smem:[#allocation70_spill]] }
0x105e   : > { %3773 = dma.vmem_to_hbm [thread:$0]  (%p5729_p0), %s5515_s4, 256, %s5512_s26, %s2926_s16, %s4682_s29, %s4683_s17, %s4684_s11  }
0x105f   : > { %s5732_s10 = sld [smem:[#allocation71_spill]]  ;;  %s1285_s6 = scalar_lea.vmem [#allocation29], %s5242_s12 }
0x1060   : > { %s2944_s28 = sshll.u32 %s1285_s6, 4  ;;  %s2921_s16 = scalar_lea.sflag [#allocation4], %s5239_s3  ;;  %s5547_s28 = int_to_ptr.vmem [resolvable:$true] %s2944_s28 }
0x1061   : > { %s4517_s29 = scalar_lea.vmem %s5547_s28, 128  ;;  %s4686_s17 = smov [#allocation29]  }
0x1062   : > { %p4518_p7 = scmp.ne.s32.totalorder %s5547_s28, %s4517_s29  ;;  %s4521_s12 = sshll.u32 %s4686_s17, 4  ;;  %s4522_s12 = int_to_ptr.vmem [resolvable:$false] %s4521_s12 }
0x1063   : > { %v3407_v46 = vld [vmem:[%s5730_s13] ss:$0 sm:$0xff]  ;;  %s4523_s11 = scalar_lea.vmem %s4522_s12, 256  ;;  %p4524_p1 = scmp.lt.s32.totalorder %s5547_s28, %s4522_s12 }
0x1064   : > { %v3408_v49 = vld [vmem:[%s5731_s7] ss:$0 sm:$0xff]  ;;  %p4519_p10 = pnand %p4518_p7, %p5729_p0  ;;  %p4525_p3 = scmp.lt.s32.totalorder %s4523_s11, %s4517_s29 }
0x1065   : > { %s5545_s9 = scalar_lea.hbm %s5732_s10, %s5478_s18 }
0x1066   : > { %p4520_p11 = pneg %p4519_p10  ;;  %p4526_p12 = por %p4525_p3, %p4524_p1 }
0x1068   : > { %p4527_p6 = pnand %p4526_p12, %p4520_p11 }
0x10c0   : > { %v2892_v37 = vpop.xlane.xlu0 %2891 }
0x10c1   : > { %v2893_v38 = vmul.f32 0.03125, %v2892_v37 }
0x10c3   : > { %v2899_v40 = vmul.f32 %v2893_v38, %v2893_v38  ;;  %v2901_v44 = vsub.f32 %v5470_v33, %v2893_v38 }
0x10c4   : > { %v2897_v39 = vpop.xlane.xlu0 %2896 }
0x10c5   : > { %v2898_v41 = vmul.f32 0.03125, %v2897_v39 }
0x10c7   : > { %v2900_v42 = vsub.f32 %v2898_v41, %v2899_v40 }
0x10c9   : > { %v2902_v43 = vadd.f32 1e-05, %v2900_v42 }
0x10cb   : > { %3975 = vrsqrt.f32 %v2902_v43 }
0x10d5   : > { %v3976_v45 = vpop.eup %3975 }
0x10d6   : > { %v2904_v47 = vmul.f32 %v3976_v45, %v2901_v44 }
0x10d8   : > { %v2911_v50 = vmul.f32 %v3407_v46, %v2904_v47 }
0x10da   : > { %v2918_v51 = vadd.f32 %v3408_v49, %v2911_v50 }
0x10dc   : > { %2919 = vst.msk [vmem:[%s1285_s6] sm:$0xff] %vm1336_vm1, %v2918_v51 }
0x10dd   : > { %4530 = shalt.err (!%p4527_p6)
}
0x10de   : > { %s4531_s3 = scalar_lea.hbm %s5545_s9, 128  ;;  %s4535_s18 = scalar_lea.hbm %s5732_s10, 256 }
0x10df   : > { %p4532_p9 = scmp.ne.s32.totalorder %s5545_s9, %s4531_s3  ;;  %p4536_p4 = scmp.lt.u32.totalorder %s5545_s9, %s5732_s10 }
0x10e0   : > { %p4537_p5 = scmp.lt.u32.totalorder %s4535_s18, %s4531_s3  ;;  %p4539_p7 = scmp.lt.u32.totalorder %s4531_s3, %s5545_s9 }
0x10e1   : > { %p4533_p8 = pnand %p4532_p9, %p5729_p0 }
0x10e2   : > { %p4538_p13 = por %p4537_p5, %p4536_p4 }
0x10e3   : > { %p4534_p2 = pneg %p4533_p8 }
0x10e4   : > { %p4540_p10 = por %p4539_p7, %p4538_p13 }
0x10e6   : > { %p4541_p11 = pnand %p4540_p10, %p4534_p2 }
0x10e8   : > { %4544 = shalt.err (!%p4541_p11)
}
0x10e9   : > { %3771 = dma.vmem_to_hbm [thread:$0]  (%p5729_p0), %s5547_s28, 128, %s5545_s9, %s2921_s16  }
0x10ea PF: > { %s5733_s26 = sld [smem:[#allocation73_spill]]  ;;  %s5734_s4 = sld [smem:[#allocation76_spill]] }
0x10eb   : > { %p5736_p3 = scmp.ge.s32.totalorder %s4623_s2, 2 }
0x10f0   : > { %s2986_s15 = sand.u32 1, %s5733_s26   ;;  %p5735_p1 = scmp.ne.s32.totalorder %s5734_s4, 0 }
0x10f1   : > { %s2987_s8 = scalar_lea.sflag [#allocation4], %s2986_s15 }
0x10f2   : > { %p3831_p12 = pnand %p5736_p3, %p5735_p1 }
0x10f4   : > { %4602 = dma.done.wait (!%p3831_p12), %s2987_s8, 128  }
0x10f5   : > { %4604 = vsyncadd (!%p3831_p12), %s2987_s8, 4294967168  ;;  %s5737_s13 = sadd.s32 4294967294, %s4623_s2  }
0x10f6   : > { %s2995_s7 = sand.u32 1, %s5737_s13  }
0x10f7   : > { %s2996_s6 = scalar_lea.sflag [#allocation31], %s2995_s7 }
0x10f8   : > { %4606 = dma.done.wait (!%p3831_p12), %s2996_s6, 512  }
0x10f9   : > { %4608 = vsyncadd (!%p3831_p12), %s2996_s6, 4294966784  ;;  %s5738_s2 = sld [smem:[#allocation74_spill]]  ;;  %s5739_s21 = sld [smem:[#allocation75_spill]] }
0x10fa   : > { %s5740_s28 = smov %s4615_s0  ;;  %s5741_s0 = smov %s4619_s1 }
0x10ff   : > { %p94_p0 = scmp.ge.s32.totalorder %s5738_s2, 4   ;;  %s5742_s1 = smov %s5739_s21 }
0x1101   :  { %96 = sbr.rel (!%p94_p0) target bundleno = 82 (0x52), region = 338 }
0x1108   :  { %3010 = vsyncpa [#allocation3], 1 }
0x1109   :  { %3012 = vsyncpa [#allocation3 + $0x1], 1 }
0x110a   :  { %3013 = vsyncpa [#allocation6], 1 }
0x110b   :  { %3015 = vsyncpa [#allocation6 + $0x1], 1 }
0x110c   :  { %3016 = vsyncpa [#allocation9], 1 }
0x110d   :  { %3018 = vsyncpa [#allocation9 + $0x1], 1 }
0x110e   :  { %3019 = vsyncpa [#allocation12], 1 }
0x110f   :  { %3020 = vsyncpa [#allocation15], 1 }
0x1110   :  { %3021 = vsyncpa [#allocation18], 1 }
0x1111   :  { %3022 = vsyncpa [#allocation21], 1 }
0x1112   :  { %3023 = vsyncpa [#allocation24], 1 }
0x1113   :  { %3024 = vsyncpa [#allocation27], 1 }
0x1114   :  { %3025 = vsyncpa [#allocation4], 1 }
0x1115   :  { %3027 = vsyncpa [#allocation4 + $0x1], 1 }
0x1116   :  { %3028 = vsyncpa [#allocation31], 1 }
0x1117   :  { %3030 = vsyncpa [#allocation31 + $0x1], 1 }

</bundles_post_ra>
